<compile_context>
chip_gen: v6e
topology: v6e:2x2x1
jax: 0.10.0
libtpu: 0.0.40
codegen_flags: <defaults>
</compile_context>

<pallas_src>
import jax
import jax.numpy as jnp
from jax.experimental import pallas as pl
from jax.experimental.pallas import tpu as pltpu

LANE = 128
VMEM_LIMIT = 32 * 1024 * 1024  # explicit scoped-VMEM limit (safe on v5e/v6e/v7x)


def _round_up(v, m):
    return ((v + m - 1) // m) * m


def _pad2d(x, rows, cols):
    r, c = x.shape
    return jnp.pad(x, ((0, rows - r), (0, cols - c)))


def _pick_tile(np_, pref):
    for t in (512, 256, 128):
        if t <= pref and np_ % t == 0:
            return t
    return 128  # np_ is always a multiple of 128


# ----------------------------------------------------------------------------
# Kernels
# ----------------------------------------------------------------------------
def _sage_layer_kernel(a_ref, hfull_ref, hblk_ref, wl_ref, wr_ref, b_ref, o_ref):
    # a_ref:     (TM, NP)  bf16 row block of the row-normalized adjacency
    # hfull_ref: (NP, DP)  bf16 all node features (resident across grid steps)
    # hblk_ref:  (TM, DP)  bf16 this row block's own features (self term)
    agg = jnp.dot(a_ref[...], hfull_ref[...], preferred_element_type=jnp.float32)
    z = jnp.dot(agg.astype(jnp.bfloat16), wl_ref[...],
                preferred_element_type=jnp.float32)
    z = z + jnp.dot(hblk_ref[...], wr_ref[...], preferred_element_type=jnp.float32)
    z = z + b_ref[...]
    o_ref[...] = jnp.maximum(z, 0.0).astype(o_ref.dtype)


def _sage_last_kernel(a_ref, hfull_ref, hblk_ref, wl_ref, wr_ref, b_ref,
                      wa_ref, wb_ref, be_ref, s_ref, t_ref):
    # Last SAGE layer fused with the (linear) out_proj/edge_proj reduction:
    # emits only per-node scores s, t — the (TM, HP) activations never hit HBM.
    agg = jnp.dot(a_ref[...], hfull_ref[...], preferred_element_type=jnp.float32)
    z = jnp.dot(agg.astype(jnp.bfloat16), wl_ref[...],
                preferred_element_type=jnp.float32)
    z = z + jnp.dot(hblk_ref[...], wr_ref[...], preferred_element_type=jnp.float32)
    h = jnp.maximum(z + b_ref[...], 0.0)                       # f32 (TM, HP)
    be = be_ref[0]                                             # scalar from SMEM
    s_ref[...] = jnp.dot(h, wa_ref[...], preferred_element_type=jnp.float32) + be
    t_ref[...] = jnp.dot(h, wb_ref[...], preferred_element_type=jnp.float32)


def _edge_logits_kernel(s_ref, t_ref, o_ref):
    # s_ref: (TM, 1) f32, t_ref: (1, TN) f32 -> broadcast add into the tile.
    o_ref[...] = s_ref[...] + t_ref[...]


# ----------------------------------------------------------------------------
# pallas_call wrappers
# ----------------------------------------------------------------------------
def _sage_layer(a_p, h_p, layer, tm):
    np_ = a_p.shape[0]
    dp = h_p.shape[1]
    doutp = layer["wl"].shape[1]
    return pl.pallas_call(
        _sage_layer_kernel,
        out_shape=jax.ShapeDtypeStruct((np_, doutp), jnp.bfloat16),
        grid=(np_ // tm,),
        in_specs=[
            pl.BlockSpec((tm, np_), lambda i: (i, 0)),     # A row block
            pl.BlockSpec((np_, dp), lambda i: (0, 0)),     # h (all nodes, resident)
            pl.BlockSpec((tm, dp), lambda i: (i, 0)),      # h row block (self term)
            pl.BlockSpec((dp, doutp), lambda i: (0, 0)),   # Wl
            pl.BlockSpec((dp, doutp), lambda i: (0, 0)),   # Wr
            pl.BlockSpec((1, doutp), lambda i: (0, 0)),    # bias
        ],
        out_specs=pl.BlockSpec((tm, doutp), lambda i: (i, 0)),
        compiler_params=pltpu.CompilerParams(
            dimension_semantics=("parallel",),
            vmem_limit_bytes=VMEM_LIMIT),
    )(a_p, h_p, h_p, layer["wl"], layer["wr"], layer["b"])


def _sage_last_layer(a_p, h_p, layer, wa_eff, wb_eff, be_eff, tm):
    np_ = a_p.shape[0]
    dp = h_p.shape[1]
    hp = layer["wl"].shape[1]
    return pl.pallas_call(
        _sage_last_kernel,
        out_shape=(jax.ShapeDtypeStruct((np_, 1), jnp.float32),
                   jax.ShapeDtypeStruct((np_, 1), jnp.float32)),
        grid=(np_ // tm,),
        in_specs=[
            pl.BlockSpec((tm, np_), lambda i: (i, 0)),     # A row block
            pl.BlockSpec((np_, dp), lambda i: (0, 0)),     # h (all nodes, resident)
            pl.BlockSpec((tm, dp), lambda i: (i, 0)),      # h row block (self term)
            pl.BlockSpec((dp, hp), lambda i: (0, 0)),      # Wl
            pl.BlockSpec((dp, hp), lambda i: (0, 0)),      # Wr
            pl.BlockSpec((1, hp), lambda i: (0, 0)),       # bias
            pl.BlockSpec((hp, 1), lambda i: (0, 0)),       # wa_eff = Wo @ wa
            pl.BlockSpec((hp, 1), lambda i: (0, 0)),       # wb_eff = Wo @ wb
            pl.BlockSpec(memory_space=pltpu.MemorySpace.SMEM),  # scalar be_eff
        ],
        out_specs=(pl.BlockSpec((tm, 1), lambda i: (i, 0)),
                   pl.BlockSpec((tm, 1), lambda i: (i, 0))),
        compiler_params=pltpu.CompilerParams(
            dimension_semantics=("parallel",),
            vmem_limit_bytes=VMEM_LIMIT),
    )(a_p, h_p, h_p, layer["wl"], layer["wr"], layer["b"], wa_eff, wb_eff, be_eff)


def _edge_logits(s, t, tm, tn):
    np_ = s.shape[0]
    # Tiny (N,) relayout between the two pallas_calls so the kernel reads a
    # lane-dense (1, TN) row of t; negligible vs. the N^2 logits writeback.
    t_row = t.reshape(1, np_)
    return pl.pallas_call(
        _edge_logits_kernel,
        # NOTE: emit bf16 here instead of f32 if the consumer tolerates it —
        # halves the N^2 HBM writeback that is this stage's roofline floor.
        out_shape=jax.ShapeDtypeStruct((np_, np_), jnp.float32),
        grid=(np_ // tm, np_ // tn),
        in_specs=[pl.BlockSpec((tm, 1), lambda i, j: (i, 0)),
                  pl.BlockSpec((1, tn), lambda i, j: (0, j))],
        out_specs=pl.BlockSpec((tm, tn), lambda i, j: (i, j)),
        compiler_params=pltpu.CompilerParams(
            dimension_semantics=("parallel", "parallel"),
            vmem_limit_bytes=VMEM_LIMIT),
    )(s, t_row)


# ----------------------------------------------------------------------------
# Params, dense mean aggregation, forward
# ----------------------------------------------------------------------------
def init_params(key, in_dim, hidden_dim, n_layers=2):
    params = {"sages": []}
    dims = [in_dim] + [hidden_dim] * n_layers
    for i in range(n_layers):
        key, k1, k2, k3 = jax.random.split(key, 4)
        din, dout = dims[i], dims[i + 1]
        scale = 1.0 / jnp.sqrt(jnp.float32(din))
        params["sages"].append({
            "wl": jax.random.uniform(k1, (din, dout), jnp.float32, -scale, scale),
            "bl": jax.random.uniform(k2, (1, dout), jnp.float32, -scale, scale),
            "wr": jax.random.uniform(k3, (din, dout), jnp.float32, -scale, scale),
        })
    key, k1, k2, k3, k4 = jax.random.split(key, 5)
    s = 1.0 / jnp.sqrt(jnp.float32(hidden_dim))
    params["wo"] = jax.random.uniform(k1, (hidden_dim, hidden_dim), jnp.float32, -s, s)
    params["bo"] = jax.random.uniform(k2, (1, hidden_dim), jnp.float32, -s, s)
    se = 1.0 / jnp.sqrt(jnp.float32(2 * hidden_dim))
    w_edge = jax.random.uniform(k3, (2 * hidden_dim, 1), jnp.float32, -se, se)
    params["wa"] = w_edge[:hidden_dim, :]     # acts on y_i
    params["wb"] = w_edge[hidden_dim:, :]     # acts on y_j
    params["be"] = jax.random.uniform(k4, (1, 1), jnp.float32, -se, se)
    return params


def prepare_params(params):
    """Pad/cast/fuse parameters ONCE, outside the jitted per-step forward."""
    prep = {"layers": []}
    for layer in params["sages"]:
        din, dout = layer["wl"].shape
        dp, doutp = _round_up(din, LANE), _round_up(dout, LANE)
        prep["layers"].append({
            "wl": _pad2d(layer["wl"], dp, doutp).astype(jnp.bfloat16),
            "wr": _pad2d(layer["wr"], dp, doutp).astype(jnp.bfloat16),
            "b":  _pad2d(layer["bl"], 1, doutp).astype(jnp.float32),
        })
    hidden = params["wo"].shape[0]
    hp = _round_up(hidden, LANE)
    # Algebraic fusion of out_proj into the edge scorer (both linear):
    #   logits[i,j] = h_i@(Wo@wa) + h_j@(Wo@wb) + (bo@wa + bo@wb + be)
    wa_eff = params["wo"] @ params["wa"]                              # (H, 1)
    wb_eff = params["wo"] @ params["wb"]                              # (H, 1)
    be_eff = (params["bo"] @ params["wa"] + params["bo"] @ params["wb"]
              + params["be"])                                         # (1, 1)
    prep["wa_eff"] = _pad2d(wa_eff, hp, 1).astype(jnp.float32)
    prep["wb_eff"] = _pad2d(wb_eff, hp, 1).astype(jnp.float32)
    prep["be_eff"] = be_eff.reshape(1).astype(jnp.float32)
    return prep


def mean_adjacency(edge_index, n):
    # edge_index: (2, E) int32, row 0 = source j, row 1 = target i (messages j->i).
    src, dst = edge_index[0], edge_index[1]
    a = jnp.zeros((n, n), jnp.float32).at[dst, src].add(1.0)
    deg = a.sum(axis=-1, keepdims=True)
    return a / jnp.maximum(deg, 1.0)   # isolated nodes aggregate to zero (PyG mean)


def sage_gnn_forward(prep, x, edge_index):
    n, din = x.shape
    np_ = _round_up(n, LANE)
    tm = _pick_tile(np_, 256)          # row tile for layers / logits rows
    tn = _pick_tile(np_, 512)          # lane-dense column tile for logits

    # TODO(synk): dense row-normalized A (bf16) — replace with CSR segment-mean
    # via PrefetchScalarGridSpec for realistic graph sizes; keep f32 if the
    # ~3-digit 1/deg quantization matters for deep stacks / high-degree nodes.
    a_p = _pad2d(mean_adjacency(edge_index, n), np_, np_).astype(jnp.bfloat16)
    h_p = _pad2d(x, np_, _round_up(din, LANE)).astype(jnp.bfloat16)

    layers = prep["layers"]
    for layer in layers[:-1]:
        h_p = _sage_layer(a_p, h_p, layer, tm)
    s, t = _sage_last_layer(a_p, h_p, layers[-1],
                            prep["wa_eff"], prep["wb_eff"], prep["be_eff"], tm)
    logits_p = _edge_logits(s, t, tm, tn)
    return logits_p[:n, :n]


def reference_forward(params, x, edge_index):
    """Plain-JAX f32 reference of the PyTorch module (for numerics validation)."""
    n = x.shape[0]
    a = mean_adjacency(edge_index, n)
    h = x
    for layer in params["sages"]:
        h = jax.nn.relu(jnp.dot(jnp.dot(a, h), layer["wl"]) + layer["bl"]
                        + jnp.dot(h, layer["wr"]))
    y = jnp.dot(h, params["wo"]) + params["bo"]
    s = jnp.dot(y, params["wa"])     # (n, 1)
    t = jnp.dot(y, params["wb"])     # (n, 1)
    return s + t.T + params["be"]


if __name__ == "__main__":
    key = jax.random.PRNGKey(0)
    n_nodes, in_dim, hidden_dim, n_layers = 16, 8, 32, 2
    n_edges = 48

    key, kx, ke, kp = jax.random.split(key, 4)
    x = jax.random.normal(kx, (n_nodes, in_dim), jnp.float32)
    edge_index = jax.random.randint(ke, (2, n_edges), 0, n_nodes, jnp.int32)
    params = init_params(kp, in_dim, hidden_dim, n_layers)

    prep = prepare_params(params)               # once, outside the step
    fwd = jax.jit(sage_gnn_forward)
    out = fwd(prep, x, edge_index)
    jax.block_until_ready(out)

    assert out.shape == (n_nodes, n_nodes) and out.dtype == jnp.float32
    # bf16 MXU inputs vs f32 reference -> loose tolerance
    ref = reference_forward(params, x, edge_index)
    assert float(jnp.max(jnp.abs(out - ref))) < 1e-1
    print("KERNEL_OK")
</pallas_src>

<mosaic_0001>
module attributes {stable_mosaic.version = 11 : i64} {
  func.func private @main(%arg0: i32) attributes {dimension_semantics = [#tpu.dimension_semantics<core_parallel>], iteration_bounds = array<i64: 2>, tpu.core_type = #tpu.core_type<sc_scalar_subcore>, window_params = []} {
    return
  }
}

module attributes {stable_mosaic.version = 11 : i64} {
  func.func private @main(%arg0: i32) attributes {dimension_semantics = [#tpu.dimension_semantics<core_parallel>], iteration_bounds = array<i64: 2>, tpu.core_type = #tpu.core_type<sc_scalar_subcore>, window_params = []} {
    return
  }
}

module attributes {stable_mosaic.version = 11 : i64} {
  func.func @_edge_logits_kernel(%arg0: i32, %arg1: i32, %arg2: memref<128x1xf32, #tpu.memory_space<vmem>>, %arg3: memref<1x128xf32, #tpu.memory_space<vmem>>, %arg4: memref<128x128xf32, #tpu.memory_space<vmem>>) attributes {dimension_semantics = [#tpu.dimension_semantics<parallel>, #tpu.dimension_semantics<parallel>], iteration_bounds = array<i64: 1, 1>, scalar_prefetch = 0 : i64, scratch_operands = 0 : i64, tpu.core_type = #tpu.core_type<tc>, window_params = [{transform_indices = @transform_0, window_bounds = array<i64: 128, 1>}, {transform_indices = @transform_1, window_bounds = array<i64: 1, 128>}, {transform_indices = @transform_2, window_bounds = array<i64: 128, 128>}]} {
    %c0 = arith.constant 0 : index
    %c0_0 = arith.constant 0 : index
    %0 = vector.load %arg2[%c0, %c0_0] : memref<128x1xf32, #tpu.memory_space<vmem>>, vector<128x1xf32>
    %c0_1 = arith.constant 0 : index
    %c0_2 = arith.constant 0 : index
    %1 = vector.load %arg3[%c0_1, %c0_2] : memref<1x128xf32, #tpu.memory_space<vmem>>, vector<1x128xf32>
    %2 = vector.broadcast %0 : vector<128x1xf32> to vector<128x128xf32>
    %3 = vector.broadcast %1 : vector<1x128xf32> to vector<128x128xf32>
    %4 = arith.addf %2, %3 : vector<128x128xf32>
    %c0_3 = arith.constant 0 : index
    %c0_4 = arith.constant 0 : index
    %5 = vector.load %arg4[%c0_3, %c0_4] : memref<128x128xf32, #tpu.memory_space<vmem>>, vector<128x128xf32>
    tpu.vector_store %arg4[%c0_3, %c0_4], %4 {strides = array<i32>} : memref<128x128xf32, #tpu.memory_space<vmem>>, vector<128x128xf32>,
    return
  }
  func.func @transform_0(%arg0: i32, %arg1: i32) -> (i32, i32) {
    %c0_i32 = arith.constant 0 : i32
    %c0_i32_0 = arith.constant 0 : i32
    return %arg0, %c0_i32 : i32, i32
  }
  func.func @transform_1(%arg0: i32, %arg1: i32) -> (i32, i32) {
    %c0_i32 = arith.constant 0 : i32
    %c0_i32_0 = arith.constant 0 : i32
    return %c0_i32, %arg1 : i32, i32
  }
  func.func @transform_2(%arg0: i32, %arg1: i32) -> (i32, i32) {
    %c0_i32 = arith.constant 0 : i32
    return %arg0, %arg1 : i32, i32
  }
}

module attributes {stable_mosaic.version = 11 : i64} {
  func.func @_sage_layer_kernel(%arg0: i32, %arg1: memref<128x128xbf16, #tpu.memory_space<vmem>>, %arg2: memref<128x128xbf16, #tpu.memory_space<vmem>>, %arg3: memref<128x128xbf16, #tpu.memory_space<vmem>>, %arg4: memref<128x128xbf16, #tpu.memory_space<vmem>>, %arg5: memref<128x128xbf16, #tpu.memory_space<vmem>>, %arg6: memref<1x128xf32, #tpu.memory_space<vmem>>, %arg7: memref<128x128xbf16, #tpu.memory_space<vmem>>) attributes {dimension_semantics = [#tpu.dimension_semantics<parallel>], iteration_bounds = array<i64: 1>, scalar_prefetch = 0 : i64, scratch_operands = 0 : i64, tpu.core_type = #tpu.core_type<tc>, window_params = [{transform_indices = @transform_0, window_bounds = array<i64: 128, 128>}, {pipeline_mode = #tpu.pipeline_mode<synchronous>, transform_indices = @transform_1, window_bounds = array<i64: 128, 128>}, {transform_indices = @transform_2, window_bounds = array<i64: 128, 128>}, {pipeline_mode = #tpu.pipeline_mode<synchronous>, transform_indices = @transform_3, window_bounds = array<i64: 128, 128>}, {pipeline_mode = #tpu.pipeline_mode<synchronous>, transform_indices = @transform_4, window_bounds = array<i64: 128, 128>}, {pipeline_mode = #tpu.pipeline_mode<synchronous>, transform_indices = @transform_5, window_bounds = array<i64: 1, 128>}, {transform_indices = @transform_6, window_bounds = array<i64: 128, 128>}]} {
    %c0 = arith.constant 0 : index
    %c0_0 = arith.constant 0 : index
    %0 = vector.load %arg1[%c0, %c0_0] : memref<128x128xbf16, #tpu.memory_space<vmem>>, vector<128x128xbf16>
    %c0_1 = arith.constant 0 : index
    %c0_2 = arith.constant 0 : index
    %1 = vector.load %arg2[%c0_1, %c0_2] : memref<128x128xbf16, #tpu.memory_space<vmem>>, vector<128x128xbf16>
    %cst = arith.constant dense<0.000000e+00> : vector<128x128xf32>
    %2 = tpu.matmul %0, %1, %cst {dimension_numbers = #tpu.dot_dimension_numbers<[1], [0], [0], [1], [0, 0, 1, 1], [], []>} : vector<128x128xbf16>, vector<128x128xbf16>, vector<128x128xf32> -> vector<128x128xf32>
    %3 = arith.truncf %2 : vector<128x128xf32> to vector<128x128xbf16>
    %c0_3 = arith.constant 0 : index
    %c0_4 = arith.constant 0 : index
    %4 = vector.load %arg4[%c0_3, %c0_4] : memref<128x128xbf16, #tpu.memory_space<vmem>>, vector<128x128xbf16>
    %cst_5 = arith.constant dense<0.000000e+00> : vector<128x128xf32>
    %5 = tpu.matmul %3, %4, %cst_5 {dimension_numbers = #tpu.dot_dimension_numbers<[1], [0], [0], [1], [0, 0, 1, 1], [], []>} : vector<128x128xbf16>, vector<128x128xbf16>, vector<128x128xf32> -> vector<128x128xf32>
    %c0_6 = arith.constant 0 : index
    %c0_7 = arith.constant 0 : index
    %6 = vector.load %arg3[%c0_6, %c0_7] : memref<128x128xbf16, #tpu.memory_space<vmem>>, vector<128x128xbf16>
    %c0_8 = arith.constant 0 : index
    %c0_9 = arith.constant 0 : index
    %7 = vector.load %arg5[%c0_8, %c0_9] : memref<128x128xbf16, #tpu.memory_space<vmem>>, vector<128x128xbf16>
    %cst_10 = arith.constant dense<0.000000e+00> : vector<128x128xf32>
    %8 = tpu.matmul %6, %7, %cst_10 {dimension_numbers = #tpu.dot_dimension_numbers<[1], [0], [0], [1], [0, 0, 1, 1], [], []>} : vector<128x128xbf16>, vector<128x128xbf16>, vector<128x128xf32> -> vector<128x128xf32>
    %9 = arith.addf %5, %8 : vector<128x128xf32>
    %c0_11 = arith.constant 0 : index
    %c0_12 = arith.constant 0 : index
    %10 = vector.load %arg6[%c0_11, %c0_12] : memref<1x128xf32, #tpu.memory_space<vmem>>, vector<1x128xf32>
    %11 = vector.broadcast %10 : vector<1x128xf32> to vector<128x128xf32>
    %12 = arith.addf %9, %11 : vector<128x128xf32>
    %cst_13 = arith.constant 0.000000e+00 : f32
    %13 = vector.broadcast %cst_13 : f32 to vector<128x128xf32>
    %14 = arith.maximumf %12, %13 : vector<128x128xf32>
    %15 = arith.truncf %14 : vector<128x128xf32> to vector<128x128xbf16>
    %c0_14 = arith.constant 0 : index
    %c0_15 = arith.constant 0 : index
    %16 = vector.load %arg7[%c0_14, %c0_15] : memref<128x128xbf16, #tpu.memory_space<vmem>>, vector<128x128xbf16>
    tpu.vector_store %arg7[%c0_14, %c0_15], %15 {strides = array<i32>} : memref<128x128xbf16, #tpu.memory_space<vmem>>, vector<128x128xbf16>,
    return
  }
  func.func @transform_0(%arg0: i32) -> (i32, i32) {
    %c0_i32 = arith.constant 0 : i32
    %c0_i32_0 = arith.constant 0 : i32
    return %arg0, %c0_i32 : i32, i32
  }
  func.func @transform_1(%arg0: i32) -> (i32, i32) {
    %c0_i32 = arith.constant 0 : i32
    %c0_i32_0 = arith.constant 0 : i32
    %c0_i32_1 = arith.constant 0 : i32
    return %c0_i32, %c0_i32_0 : i32, i32
  }
  func.func @transform_2(%arg0: i32) -> (i32, i32) {
    %c0_i32 = arith.constant 0 : i32
    %c0_i32_0 = arith.constant 0 : i32
    return %arg0, %c0_i32 : i32, i32
  }
  func.func @transform_3(%arg0: i32) -> (i32, i32) {
    %c0_i32 = arith.constant 0 : i32
    %c0_i32_0 = arith.constant 0 : i32
    %c0_i32_1 = arith.constant 0 : i32
    return %c0_i32, %c0_i32_0 : i32, i32
  }
  func.func @transform_4(%arg0: i32) -> (i32, i32) {
    %c0_i32 = arith.constant 0 : i32
    %c0_i32_0 = arith.constant 0 : i32
    %c0_i32_1 = arith.constant 0 : i32
    return %c0_i32, %c0_i32_0 : i32, i32
  }
  func.func @transform_5(%arg0: i32) -> (i32, i32) {
    %c0_i32 = arith.constant 0 : i32
    %c0_i32_0 = arith.constant 0 : i32
    %c0_i32_1 = arith.constant 0 : i32
    return %c0_i32, %c0_i32_0 : i32, i32
  }
  func.func @transform_6(%arg0: i32) -> (i32, i32) {
    %c0_i32 = arith.constant 0 : i32
    %c0_i32_0 = arith.constant 0 : i32
    return %arg0, %c0_i32 : i32, i32
  }
}

module attributes {stable_mosaic.version = 11 : i64} {
  func.func @_sage_last_kernel(%arg0: i32, %arg1: memref<128x128xbf16, #tpu.memory_space<vmem>>, %arg2: memref<128x128xbf16, #tpu.memory_space<vmem>>, %arg3: memref<128x128xbf16, #tpu.memory_space<vmem>>, %arg4: memref<128x128xbf16, #tpu.memory_space<vmem>>, %arg5: memref<128x128xbf16, #tpu.memory_space<vmem>>, %arg6: memref<1x128xf32, #tpu.memory_space<vmem>>, %arg7: memref<128x1xf32, #tpu.memory_space<vmem>>, %arg8: memref<128x1xf32, #tpu.memory_space<vmem>>, %arg9: memref<1xf32, #tpu.memory_space<smem>>, %arg10: memref<128x1xf32, #tpu.memory_space<vmem>>, %arg11: memref<128x1xf32, #tpu.memory_space<vmem>>) attributes {dimension_semantics = [#tpu.dimension_semantics<parallel>], iteration_bounds = array<i64: 1>, scalar_prefetch = 0 : i64, scratch_operands = 0 : i64, tpu.core_type = #tpu.core_type<tc>, window_params = [{transform_indices = @transform_0, window_bounds = array<i64: 128, 128>}, {pipeline_mode = #tpu.pipeline_mode<synchronous>, transform_indices = @transform_1, window_bounds = array<i64: 128, 128>}, {transform_indices = @transform_2, window_bounds = array<i64: 128, 128>}, {pipeline_mode = #tpu.pipeline_mode<synchronous>, transform_indices = @transform_3, window_bounds = array<i64: 128, 128>}, {pipeline_mode = #tpu.pipeline_mode<synchronous>, transform_indices = @transform_4, window_bounds = array<i64: 128, 128>}, {pipeline_mode = #tpu.pipeline_mode<synchronous>, transform_indices = @transform_5, window_bounds = array<i64: 1, 128>}, {pipeline_mode = #tpu.pipeline_mode<synchronous>, transform_indices = @transform_6, window_bounds = array<i64: 128, 1>}, {pipeline_mode = #tpu.pipeline_mode<synchronous>, transform_indices = @transform_7, window_bounds = array<i64: 128, 1>}, {transform_indices = @transform_8, window_bounds = array<i64: 1>}, {transform_indices = @transform_9, window_bounds = array<i64: 128, 1>}, {transform_indices = @transform_10, window_bounds = array<i64: 128, 1>}]} {
    %c0 = arith.constant 0 : index
    %c0_0 = arith.constant 0 : index
    %0 = vector.load %arg1[%c0, %c0_0] : memref<128x128xbf16, #tpu.memory_space<vmem>>, vector<128x128xbf16>
    %c0_1 = arith.constant 0 : index
    %c0_2 = arith.constant 0 : index
    %1 = vector.load %arg2[%c0_1, %c0_2] : memref<128x128xbf16, #tpu.memory_space<vmem>>, vector<128x128xbf16>
    %cst = arith.constant dense<0.000000e+00> : vector<128x128xf32>
    %2 = tpu.matmul %0, %1, %cst {dimension_numbers = #tpu.dot_dimension_numbers<[1], [0], [0], [1], [0, 0, 1, 1], [], []>} : vector<128x128xbf16>, vector<128x128xbf16>, vector<128x128xf32> -> vector<128x128xf32>
    %3 = arith.truncf %2 : vector<128x128xf32> to vector<128x128xbf16>
    %c0_3 = arith.constant 0 : index
    %c0_4 = arith.constant 0 : index
    %4 = vector.load %arg4[%c0_3, %c0_4] : memref<128x128xbf16, #tpu.memory_space<vmem>>, vector<128x128xbf16>
    %cst_5 = arith.constant dense<0.000000e+00> : vector<128x128xf32>
    %5 = tpu.matmul %3, %4, %cst_5 {dimension_numbers = #tpu.dot_dimension_numbers<[1], [0], [0], [1], [0, 0, 1, 1], [], []>} : vector<128x128xbf16>, vector<128x128xbf16>, vector<128x128xf32> -> vector<128x128xf32>
    %c0_6 = arith.constant 0 : index
    %c0_7 = arith.constant 0 : index
    %6 = vector.load %arg3[%c0_6, %c0_7] : memref<128x128xbf16, #tpu.memory_space<vmem>>, vector<128x128xbf16>
    %c0_8 = arith.constant 0 : index
    %c0_9 = arith.constant 0 : index
    %7 = vector.load %arg5[%c0_8, %c0_9] : memref<128x128xbf16, #tpu.memory_space<vmem>>, vector<128x128xbf16>
    %cst_10 = arith.constant dense<0.000000e+00> : vector<128x128xf32>
    %8 = tpu.matmul %6, %7, %cst_10 {dimension_numbers = #tpu.dot_dimension_numbers<[1], [0], [0], [1], [0, 0, 1, 1], [], []>} : vector<128x128xbf16>, vector<128x128xbf16>, vector<128x128xf32> -> vector<128x128xf32>
    %9 = arith.addf %5, %8 : vector<128x128xf32>
    %c0_11 = arith.constant 0 : index
    %c0_12 = arith.constant 0 : index
    %10 = vector.load %arg6[%c0_11, %c0_12] : memref<1x128xf32, #tpu.memory_space<vmem>>, vector<1x128xf32>
    %11 = vector.broadcast %10 : vector<1x128xf32> to vector<128x128xf32>
    %12 = arith.addf %9, %11 : vector<128x128xf32>
    %cst_13 = arith.constant 0.000000e+00 : f32
    %13 = vector.broadcast %cst_13 : f32 to vector<128x128xf32>
    %14 = arith.maximumf %12, %13 : vector<128x128xf32>
    %c0_14 = arith.constant 0 : index
    %15 = memref.load %arg9[%c0_14] : memref<1xf32, #tpu.memory_space<smem>>
    %c0_15 = arith.constant 0 : index
    %c0_16 = arith.constant 0 : index
    %16 = vector.load %arg7[%c0_15, %c0_16] : memref<128x1xf32, #tpu.memory_space<vmem>>, vector<128x1xf32>
    %cst_17 = arith.constant dense<0.000000e+00> : vector<128x1xf32>
    %17 = tpu.matmul %14, %16, %cst_17 {dimension_numbers = #tpu.dot_dimension_numbers<[1], [0], [0], [1], [0, 0, 1, 1], [], []>} : vector<128x128xf32>, vector<128x1xf32>, vector<128x1xf32> -> vector<128x1xf32>
    %18 = vector.broadcast %15 : f32 to vector<128x1xf32>
    %19 = arith.addf %17, %18 : vector<128x1xf32>
    %c0_18 = arith.constant 0 : index
    %c0_19 = arith.constant 0 : index
    %20 = vector.load %arg10[%c0_18, %c0_19] : memref<128x1xf32, #tpu.memory_space<vmem>>, vector<128x1xf32>
    tpu.vector_store %arg10[%c0_18, %c0_19], %19 {strides = array<i32>} : memref<128x1xf32, #tpu.memory_space<vmem>>, vector<128x1xf32>,
    %c0_20 = arith.constant 0 : index
    %c0_21 = arith.constant 0 : index
    %21 = vector.load %arg8[%c0_20, %c0_21] : memref<128x1xf32, #tpu.memory_space<vmem>>, vector<128x1xf32>
    %cst_22 = arith.constant dense<0.000000e+00> : vector<128x1xf32>
    %22 = tpu.matmul %14, %21, %cst_22 {dimension_numbers = #tpu.dot_dimension_numbers<[1], [0], [0], [1], [0, 0, 1, 1], [], []>} : vector<128x128xf32>, vector<128x1xf32>, vector<128x1xf32> -> vector<128x1xf32>
    %c0_23 = arith.constant 0 : index
    %c0_24 = arith.constant 0 : index
    %23 = vector.load %arg11[%c0_23, %c0_24] : memref<128x1xf32, #tpu.memory_space<vmem>>, vector<128x1xf32>
    tpu.vector_store %arg11[%c0_23, %c0_24], %22 {strides = array<i32>} : memref<128x1xf32, #tpu.memory_space<vmem>>, vector<128x1xf32>,
    return
  }
  func.func @transform_0(%arg0: i32) -> (i32, i32) {
    %c0_i32 = arith.constant 0 : i32
    %c0_i32_0 = arith.constant 0 : i32
    return %arg0, %c0_i32 : i32, i32
  }
  func.func @transform_1(%arg0: i32) -> (i32, i32) {
    %c0_i32 = arith.constant 0 : i32
    %c0_i32_0 = arith.constant 0 : i32
    %c0_i32_1 = arith.constant 0 : i32
    return %c0_i32, %c0_i32_0 : i32, i32
  }
  func.func @transform_2(%arg0: i32) -> (i32, i32) {
    %c0_i32 = arith.constant 0 : i32
    %c0_i32_0 = arith.constant 0 : i32
    return %arg0, %c0_i32 : i32, i32
  }
  func.func @transform_3(%arg0: i32) -> (i32, i32) {
    %c0_i32 = arith.constant 0 : i32
    %c0_i32_0 = arith.constant 0 : i32
    %c0_i32_1 = arith.constant 0 : i32
    return %c0_i32, %c0_i32_0 : i32, i32
  }
  func.func @transform_4(%arg0: i32) -> (i32, i32) {
    %c0_i32 = arith.constant 0 : i32
    %c0_i32_0 = arith.constant 0 : i32
    %c0_i32_1 = arith.constant 0 : i32
    return %c0_i32, %c0_i32_0 : i32, i32
  }
  func.func @transform_5(%arg0: i32) -> (i32, i32) {
    %c0_i32 = arith.constant 0 : i32
    %c0_i32_0 = arith.constant 0 : i32
    %c0_i32_1 = arith.constant 0 : i32
    return %c0_i32, %c0_i32_0 : i32, i32
  }
  func.func @transform_6(%arg0: i32) -> (i32, i32) {
    %c0_i32 = arith.constant 0 : i32
    %c0_i32_0 = arith.constant 0 : i32
    %c0_i32_1 = arith.constant 0 : i32
    return %c0_i32, %c0_i32_0 : i32, i32
  }
  func.func @transform_7(%arg0: i32) -> (i32, i32) {
    %c0_i32 = arith.constant 0 : i32
    %c0_i32_0 = arith.constant 0 : i32
    %c0_i32_1 = arith.constant 0 : i32
    return %c0_i32, %c0_i32_0 : i32, i32
  }
  func.func @transform_8(%arg0: i32) -> i32 {
    %c0_i32 = arith.constant 0 : i32
    %c0_i32_0 = arith.constant 0 : i32
    return %c0_i32 : i32
  }
  func.func @transform_9(%arg0: i32) -> (i32, i32) {
    %c0_i32 = arith.constant 0 : i32
    %c0_i32_0 = arith.constant 0 : i32
    return %arg0, %c0_i32 : i32, i32
  }
  func.func @transform_10(%arg0: i32) -> (i32, i32) {
    %c0_i32 = arith.constant 0 : i32
    %c0_i32_0 = arith.constant 0 : i32
    return %arg0, %c0_i32 : i32, i32
  }
}

</mosaic_0001>

<bundles_post_ra>
// kernel: sage_gnn_forward.5
= control target key start
LH: loop header
LB: loop body
LE: loop exit
PB: predicated region body
PF: predicated region fallthrough
CT: control target
= control target key end

     0   :  { %v154_v0 = vmov 0   ;;  %s269_s0 = inlined_call_operand.vmem [shape: f32[128,1], index: 0, kind: input, shape index: {}]   ;;  %s270_s1 = inlined_call_operand.vmem [shape: f32[1,128], index: 1, kind: input, shape index: {}]   ;;  %s271_s2 = inlined_call_operand.vmem [shape: f32[128,128], index: 2, kind: output, shape index: {}]  }
   0x1   :  { %153 = vset.pattern.permute.xlu1 %v154_v0  ;;  %152 = vset.pattern.permute.xlu0 %v154_v0  ;;  %v13_v1 = vld [vmem:[%s269_s0 + $0x10] sm:$0xff]  ;;  %v11_v2 = vld [vmem:[%s269_s0] sm:$0xff]  ;;  %v14_v3 = vld [vmem:[%s269_s0 + $0x18] sm:$0xff] }
   0x2   :  { %40 = vperm.xlu1 %153, %v13_v1   ;;  %30 = vperm.xlu0 %152, %v11_v2   ;;  %v12_v4 = vld [vmem:[%s269_s0 + $0x8] sm:$0xff]  ;;  %v15_v6 = vld [vmem:[%s269_s0 + $0x20] sm:$0xff]  ;;  %v18_v7 = vld [vmem:[%s269_s0 + $0x38] sm:$0xff] }
   0x3   :  { %v16_v5 = vld [vmem:[%s269_s0 + $0x28] sm:$0xff]  ;;  %v17_v8 = vld [vmem:[%s269_s0 + $0x30] sm:$0xff]  ;;  %v19_v10 = vld [vmem:[%s269_s0 + $0x40] sm:$0xff] }
   0x4   :  { %v20_v9 = vld [vmem:[%s269_s0 + $0x48] sm:$0xff]  ;;  %v22_v11 = vld [vmem:[%s269_s0 + $0x58] sm:$0xff]  ;;  %v21_v12 = vld [vmem:[%s269_s0 + $0x50] sm:$0xff] }
   0x5   :  { %v24_v13 = vld [vmem:[%s269_s0 + $0x68] sm:$0xff]  ;;  %v23_v14 = vld [vmem:[%s269_s0 + $0x60] sm:$0xff]  ;;  %v26_v15 = vld [vmem:[%s269_s0 + $0x78] sm:$0xff] }
   0x6   :  { %45 = vperm.xlu1 %153, %v14_v3   ;;  %35 = vperm.xlu0 %152, %v12_v4   ;;  %v25_v16 = vld [vmem:[%s269_s0 + $0x70] sm:$0xff]  ;;  %v150_v17 = vld [vmem:[%s270_s1] ss:$0 sm:$0xff] }
   0xa   :  { %55 = vperm.xlu1 %153, %v16_v5   ;;  %50 = vperm.xlu0 %152, %v15_v6  }
   0xe   :  { %65 = vperm.xlu1 %153, %v18_v7   ;;  %60 = vperm.xlu0 %152, %v17_v8  }
  0x12   :  { %75 = vperm.xlu1 %153, %v20_v9   ;;  %70 = vperm.xlu0 %152, %v19_v10  }
  0x16   :  { %85 = vperm.xlu1 %153, %v22_v11   ;;  %80 = vperm.xlu0 %152, %v21_v12  }
  0x1a   :  { %95 = vperm.xlu1 %153, %v24_v13   ;;  %90 = vperm.xlu0 %152, %v23_v14  }
  0x1e   :  { %105 = vperm.xlu1 %153, %v26_v15   ;;  %100 = vperm.xlu0 %152, %v25_v16  }
  0x7d   :  { %v41_v18 = vpop.permute.xlu1 %40  ;;  %v31_v19 = vpop.permute.xlu0 %30 }
  0x7e   :  { %v116_v20 = vadd.f32 %v150_v17, %v41_v18  ;;  %v114_v21 = vadd.f32 %v150_v17, %v31_v19 }
  0x80   :  { %132 = vst [vmem:[%s271_s2 + $0x10] sm:$0xff] %v116_v20  ;;  %130 = vst [vmem:[%s271_s2] sm:$0xff] %v114_v21 }
  0x81   :  { %v46_v22 = vpop.permute.xlu1 %45  ;;  %v36_v23 = vpop.permute.xlu0 %35 }
  0x82   :  { %v117_v24 = vadd.f32 %v150_v17, %v46_v22  ;;  %v115_v25 = vadd.f32 %v150_v17, %v36_v23 }
  0x84   :  { %133 = vst [vmem:[%s271_s2 + $0x18] sm:$0xff] %v117_v24  ;;  %131 = vst [vmem:[%s271_s2 + $0x8] sm:$0xff] %v115_v25 }
  0x85   :  { %v56_v26 = vpop.permute.xlu1 %55  ;;  %v51_v27 = vpop.permute.xlu0 %50 }
  0x86   :  { %v119_v28 = vadd.f32 %v150_v17, %v56_v26  ;;  %v118_v29 = vadd.f32 %v150_v17, %v51_v27 }
  0x88   :  { %135 = vst [vmem:[%s271_s2 + $0x28] sm:$0xff] %v119_v28  ;;  %134 = vst [vmem:[%s271_s2 + $0x20] sm:$0xff] %v118_v29 }
  0x89   :  { %v66_v30 = vpop.permute.xlu1 %65  ;;  %v61_v31 = vpop.permute.xlu0 %60 }
  0x8a   :  { %v121_v32 = vadd.f32 %v150_v17, %v66_v30  ;;  %v120_v33 = vadd.f32 %v150_v17, %v61_v31 }
  0x8c   :  { %137 = vst [vmem:[%s271_s2 + $0x38] sm:$0xff] %v121_v32  ;;  %136 = vst [vmem:[%s271_s2 + $0x30] sm:$0xff] %v120_v33 }
  0x8d   :  { %v76_v34 = vpop.permute.xlu1 %75  ;;  %v71_v35 = vpop.permute.xlu0 %70 }
  0x8e   :  { %v123_v36 = vadd.f32 %v150_v17, %v76_v34  ;;  %v122_v37 = vadd.f32 %v150_v17, %v71_v35 }
  0x90   :  { %139 = vst [vmem:[%s271_s2 + $0x48] sm:$0xff] %v123_v36  ;;  %138 = vst [vmem:[%s271_s2 + $0x40] sm:$0xff] %v122_v37 }
  0x91   :  { %v86_v38 = vpop.permute.xlu1 %85  ;;  %v81_v39 = vpop.permute.xlu0 %80 }
  0x92   :  { %v125_v40 = vadd.f32 %v150_v17, %v86_v38  ;;  %v124_v41 = vadd.f32 %v150_v17, %v81_v39 }
  0x94   :  { %141 = vst [vmem:[%s271_s2 + $0x58] sm:$0xff] %v125_v40  ;;  %140 = vst [vmem:[%s271_s2 + $0x50] sm:$0xff] %v124_v41 }
  0x95   :  { %v96_v42 = vpop.permute.xlu1 %95  ;;  %v91_v43 = vpop.permute.xlu0 %90 }
  0x96   :  { %v127_v44 = vadd.f32 %v150_v17, %v96_v42  ;;  %v126_v45 = vadd.f32 %v150_v17, %v91_v43 }
  0x98   :  { %143 = vst [vmem:[%s271_s2 + $0x68] sm:$0xff] %v127_v44  ;;  %142 = vst [vmem:[%s271_s2 + $0x60] sm:$0xff] %v126_v45 }
  0x99   :  { %v106_v46 = vpop.permute.xlu1 %105  ;;  %v101_v47 = vpop.permute.xlu0 %100 }
  0x9a   :  { %v129_v48 = vadd.f32 %v150_v17, %v106_v46  ;;  %v128_v49 = vadd.f32 %v150_v17, %v101_v47 }
  0x9c   :  { %145 = vst [vmem:[%s271_s2 + $0x78] sm:$0xff] %v129_v48  ;;  %144 = vst [vmem:[%s271_s2 + $0x70] sm:$0xff] %v128_v49 }

// kernel: sage_gnn_forward.3
= control target key start
LH: loop header
LB: loop body
LE: loop exit
PB: predicated region body
PF: predicated region fallthrough
CT: control target
= control target key end

     0   :  { %s1286_s1 = inlined_call_operand.vmem [shape: bf16[128,128], index: 1, kind: input, shape index: {}, may-alias: {1,2}]   ;;  %s1287_s0 = inlined_call_operand.vmem [shape: bf16[128,128], index: 0, kind: input, shape index: {}]   ;;  %s1288_s4 = inlined_call_operand.vmem [shape: bf16[128,128], index: 4, kind: input, shape index: {}]   ;;  %s1289_s3 = inlined_call_operand.vmem [shape: bf16[128,128], index: 3, kind: input, shape index: {}]   ;;  %s1290_s2 = inlined_call_operand.vmem [shape: bf16[128,128], index: 2, kind: input, shape index: {}, may-alias: {1,2}]   ;;  %s1291_s5 = inlined_call_operand.vmem [shape: f32[1,128], index: 5, kind: input, shape index: {}]   ;;  %s1292_s6 = inlined_call_operand.vmem [shape: bf16[128,128], index: 6, kind: output, shape index: {}]  }
   0x1   :  { %v1046_v0 = vld [vmem:[%s1286_s1 + $0x38] sm:$0xff]   ;;  %v1047_v1 = vld [vmem:[%s1286_s1 + $0x30] sm:$0xff]   ;;  %v1048_v2 = vld [vmem:[%s1286_s1 + $0x28] sm:$0xff]  }
   0x2   :  { %934 = vmatprep.subr.bf16.mxu0 %v1046_v0  ;;  %v1049_v3 = vld [vmem:[%s1286_s1 + $0x20] sm:$0xff]   ;;  %v1050_v5 = vld [vmem:[%s1286_s1 + $0x18] sm:$0xff]   ;;  %v1051_v6 = vld [vmem:[%s1286_s1 + $0x10] sm:$0xff]  }
   0x3   :  { %935 = vmatpush3.bf16.msra.mxu0 %v1046_v0  ;;  %v1054_v4 = vld [vmem:[%s1287_s0] sm:$0xff]   ;;  %v1062_v7 = vld [vmem:[%s1288_s4 + $0x38] sm:$0xff]   ;;  %v1063_v8 = vld [vmem:[%s1288_s4 + $0x30] sm:$0xff]  }
   0x4   :  { %936 = vmatprep.subr.bf16.mxu0 %v1047_v1  ;;  %950 = vmatprep.mubr.bf16.mxu0 %v1054_v4  ;;  %v1052_v9 = vld [vmem:[%s1286_s1 + $0x8] sm:$0xff]   ;;  %v1053_v11 = vld [vmem:[%s1286_s1] sm:$0xff]   ;;  %v1066_v13 = vld [vmem:[%s1288_s4 + $0x18] sm:$0xff]  }
   0x5   :  { %966 = vmatprep.subr.bf16.mxu1 %v1062_v7  ;;  %v1064_v10 = vld [vmem:[%s1288_s4 + $0x28] sm:$0xff]   ;;  %v1065_v12 = vld [vmem:[%s1288_s4 + $0x20] sm:$0xff]   ;;  %v1068_v15 = vld [vmem:[%s1289_s3 + $0x38] sm:$0xff]  }
   0x6   :  { %967 = vmatpush3.bf16.msra.mxu1 %v1062_v7  ;;  %v1073_v14 = vld [vmem:[%s1290_s2] sm:$0xff]   ;;  %v1055_v16 = vld [vmem:[%s1287_s0 + $0x8] sm:$0xff]   ;;  %v1056_v17 = vld [vmem:[%s1287_s0 + $0x10] sm:$0xff]  }
   0x7   :  { %937 = vmatpush3.bf16.msra.mxu0 %v1047_v1  ;;  %968 = vmatprep.subr.bf16.mxu1 %v1063_v8  ;;  %v1067_v18 = vld [vmem:[%s1288_s4 + $0x10] sm:$0xff]   ;;  %v1069_v20 = vld [vmem:[%s1288_s4 + $0x8] sm:$0xff]   ;;  %v1057_v22 = vld [vmem:[%s1287_s0 + $0x18] sm:$0xff]  }
   0x8   :  { %938 = vmatprep.subr.bf16.mxu0 %v1048_v2  ;;  %982 = vmatprep.mubr.bf16.mxu1 %v1073_v14  ;;  %v1070_v19 = vld [vmem:[%s1289_s3 + $0x30] sm:$0xff]   ;;  %v1072_v21 = vld [vmem:[%s1289_s3 + $0x28] sm:$0xff]   ;;  %v1058_v23 = vld [vmem:[%s1287_s0 + $0x20] sm:$0xff]  }
   0x9   :  { %v1071_v24 = vld [vmem:[%s1288_s4] sm:$0xff]   ;;  %v1076_v26 = vld [vmem:[%s1289_s3 + $0x18] sm:$0xff]   ;;  %v1059_v27 = vld [vmem:[%s1287_s0 + $0x28] sm:$0xff]  }
   0xa   :  { %969 = vmatpush3.bf16.msra.mxu1 %v1063_v8  ;;  %v1075_v25 = vld [vmem:[%s1289_s3 + $0x20] sm:$0xff]   ;;  %v1074_v28 = vld [vmem:[%s1290_s2 + $0x8] sm:$0xff]   ;;  %v1060_v29 = vld [vmem:[%s1287_s0 + $0x30] sm:$0xff]  }
   0xb   :  { %939 = vmatpush3.bf16.msra.mxu0 %v1048_v2  ;;  %970 = vmatprep.subr.bf16.mxu1 %v1064_v10  ;;  %v1077_v30 = vld [vmem:[%s1290_s2 + $0x10] sm:$0xff]   ;;  %v1061_v32 = vld [vmem:[%s1287_s0 + $0x38] sm:$0xff]   ;;  %v1080_v34 = vld [vmem:[%s1289_s3 + $0x8] sm:$0xff]  }
   0xc   :  { %940 = vmatprep.subr.bf16.mxu0 %v1049_v3  ;;  %v1079_v31 = vld [vmem:[%s1289_s3 + $0x10] sm:$0xff]   ;;  %v1078_v33 = vld [vmem:[%s1290_s2 + $0x18] sm:$0xff]   ;;  %v1081_v35 = vld [vmem:[%s1290_s2 + $0x20] sm:$0xff]  }
   0xd   :  { %v1082_v36 = vld [vmem:[%s1290_s2 + $0x28] sm:$0xff]   ;;  %v1083_v37 = vld [vmem:[%s1289_s3] sm:$0xff]   ;;  %v1084_v38 = vld [vmem:[%s1290_s2 + $0x30] sm:$0xff]  }
   0xe   :  { %971 = vmatpush3.bf16.msra.mxu1 %v1064_v10  ;;  %v1085_v39 = vld [vmem:[%s1290_s2 + $0x38] sm:$0xff]   ;;  %v1244_v14 = vld [vmem:[%s1291_s5] ss:$0 sm:$0xff] }
   0xf   :  { %941 = vmatpush3.bf16.msra.mxu0 %v1049_v3  ;;  %972 = vmatprep.subr.bf16.mxu1 %v1065_v12 }
  0x10   :  { %942 = vmatprep.subr.bf16.mxu0 %v1050_v5 }
  0x12   :  { %973 = vmatpush3.bf16.msra.mxu1 %v1065_v12 }
  0x13   :  { %943 = vmatpush3.bf16.msra.mxu0 %v1050_v5  ;;  %974 = vmatprep.subr.bf16.mxu1 %v1066_v13 }
  0x14   :  { %944 = vmatprep.subr.bf16.mxu0 %v1051_v6 }
  0x16   :  { %975 = vmatpush3.bf16.msra.mxu1 %v1066_v13 }
  0x17   :  { %945 = vmatpush3.bf16.msra.mxu0 %v1051_v6  ;;  %976 = vmatprep.subr.bf16.mxu1 %v1067_v18 }
  0x18   :  { %946 = vmatprep.subr.bf16.mxu0 %v1052_v9 }
  0x1a   :  { %977 = vmatpush3.bf16.msra.mxu1 %v1067_v18 }
  0x1b   :  { %947 = vmatpush3.bf16.msra.mxu0 %v1052_v9  ;;  %978 = vmatprep.subr.bf16.mxu1 %v1069_v20 }
  0x1c   :  { %948 = vmatprep.subr.bf16.mxu0 %v1053_v11 }
  0x1e   :  { %979 = vmatpush3.bf16.msra.mxu1 %v1069_v20 }
  0x1f   :  { %949 = vmatpush3.bf16.msra.mxu0 %v1053_v11  ;;  %980 = vmatprep.subr.bf16.mxu1 %v1071_v24 }
  0x20   :  { %998 = vmatprep.subr.bf16.mxu0 %v1068_v15 }
  0x22   :  { %951 = vmatmul.mubr.bf16.vlgmr.msra.gmra.mxu0 %v1055_v16  ;;  %981 = vmatpush3.bf16.msra.mxu1 %v1071_v24 }
  0x23   :  { %954 = vmatprep.mubr.bf16.mxu0 %v1056_v17  ;;  %999 = vmatpush3.bf16.msra.mxu0 %v1068_v15 }
  0x24   :  { %1000 = vmatprep.subr.bf16.mxu0 %v1070_v19  ;;  %1030 = vmatprep.subr.bf16.mxu1 %v1068_v15 }
  0x25   :  { %983 = vmatmul.mubr.bf16.vlgmr.msra.gmra.mxu1 %v1074_v28 }
  0x26   :  { %1038 = vmatpush3.bf16.msra.mxu1 %v1068_v15  ;;  %986 = vmatprep.mubr.bf16.mxu1 %v1077_v30 }
  0x27   :  { %1001 = vmatpush3.bf16.msra.mxu0 %v1070_v19  ;;  %1031 = vmatprep.subr.bf16.mxu1 %v1070_v19 }
  0x28   :  { %1002 = vmatprep.subr.bf16.mxu0 %v1072_v21 }
  0x2a   :  { %955 = vmatmul.mubr.bf16.gmra.mxu0 %v1057_v22  ;;  %1039 = vmatpush3.bf16.msra.mxu1 %v1070_v19 }
  0x2b   :  { %958 = vmatprep.mubr.bf16.mxu0 %v1058_v23  ;;  %1003 = vmatpush3.bf16.msra.mxu0 %v1072_v21 }
  0x2c   :  { %1004 = vmatprep.subr.bf16.mxu0 %v1075_v25  ;;  %1032 = vmatprep.subr.bf16.mxu1 %v1072_v21 }
  0x2d   :  { %987 = vmatmul.mubr.bf16.gmra.mxu1 %v1078_v33 }
  0x2e   :  { %1040 = vmatpush3.bf16.msra.mxu1 %v1072_v21  ;;  %990 = vmatprep.mubr.bf16.mxu1 %v1081_v35 }
  0x2f   :  { %1005 = vmatpush3.bf16.msra.mxu0 %v1075_v25  ;;  %1033 = vmatprep.subr.bf16.mxu1 %v1075_v25 }
  0x30   :  { %1006 = vmatprep.subr.bf16.mxu0 %v1076_v26 }
  0x32   :  { %959 = vmatmul.mubr.bf16.gmra.mxu0 %v1059_v27  ;;  %1041 = vmatpush3.bf16.msra.mxu1 %v1075_v25 }
  0x33   :  { %962 = vmatprep.mubr.bf16.mxu0 %v1060_v29  ;;  %1007 = vmatpush3.bf16.msra.mxu0 %v1076_v26 }
  0x34   :  { %1008 = vmatprep.subr.bf16.mxu0 %v1079_v31  ;;  %1034 = vmatprep.subr.bf16.mxu1 %v1076_v26 }
  0x35   :  { %991 = vmatmul.mubr.bf16.gmra.mxu1 %v1082_v36 }
  0x36   :  { %1042 = vmatpush3.bf16.msra.mxu1 %v1076_v26  ;;  %994 = vmatprep.mubr.bf16.mxu1 %v1084_v38 }
  0x37   :  { %1009 = vmatpush3.bf16.msra.mxu0 %v1079_v31  ;;  %1035 = vmatprep.subr.bf16.mxu1 %v1079_v31 }
  0x38   :  { %1010 = vmatprep.subr.bf16.mxu0 %v1080_v34 }
  0x3a   :  { %963 = vmatmul.mubr.bf16.gmra.mxu0 %v1061_v32  ;;  %1043 = vmatpush3.bf16.msra.mxu1 %v1079_v31 }
  0x3b   :  { %1036 = vmatprep.subr.bf16.mxu1 %v1080_v34  ;;  %1011 = vmatpush3.bf16.msra.mxu0 %v1080_v34 }
  0x3c   :  { %1012 = vmatprep.subr.bf16.mxu0 %v1083_v37 }
  0x3d   :  { %995 = vmatmul.mubr.bf16.gmra.mxu1 %v1085_v39 }
  0x3e   :  { %1044 = vmatpush3.bf16.msra.mxu1 %v1080_v34 }
  0x3f   :  { %1037 = vmatprep.subr.bf16.mxu1 %v1083_v37  ;;  %1013 = vmatpush3.bf16.msra.mxu0 %v1083_v37 }
  0x42   :  { %1045 = vmatpush3.bf16.msra.mxu1 %v1083_v37 }
  0xe2   :  { %v952_v40 = vpop.f32.mrf.mxu0 }
  0xe4   :  { %v186_v41 = vpop.f32.mrf.mxu0 }
  0xe5   :  { %v984_v0 = vpop.f32.mrf.mxu1 }
  0xe6   :  { %v953_v42 = vpop.f32.mrf.mxu0 }
  0xe7   :  { %v250_v45 = vpack.c.bf16 %v953_v42, %v952_v40  ;;  %v435_v1 = vpop.f32.mrf.mxu1 }
  0xe8   :  { %v189_v43 = vpop.f32.mrf.mxu0 }
  0xe9   :  { %v249_v44 = vpack.c.bf16 %v189_v43, %v186_v41  ;;  %v985_v2 = vpop.f32.mrf.mxu1 }
  0xea   :  { %v956_v46 = vpop.f32.mrf.mxu0 }
  0xeb   :  { %1014 = vmatprep.mubr.bf16.mxu0 %v249_v44  ;;  %v438_v3 = vpop.f32.mrf.mxu1 }
  0xec   :  { %v202_v47 = vpop.f32.mrf.mxu0  ;;  %1015 = vmatmul.mubr.bf16.vlgmr.msra.gmra.mxu0 %v250_v45 }
  0xed   :  { %v988_v4 = vpop.f32.mrf.mxu1 }
  0xee   :  { %v957_v48 = vpop.f32.mrf.mxu0 }
  0xef   :  { %v252_v51 = vpack.c.bf16 %v957_v48, %v956_v46  ;;  %v451_v5 = vpop.f32.mrf.mxu1 }
  0xf0   :  { %v205_v49 = vpop.f32.mrf.mxu0 }
  0xf1   :  { %v251_v50 = vpack.c.bf16 %v205_v49, %v202_v47  ;;  %v989_v6 = vpop.f32.mrf.mxu1 }
  0xf2   :  { %v960_v52 = vpop.f32.mrf.mxu0 }
  0xf3   :  { %1018 = vmatprep.mubr.bf16.mxu0 %v251_v50  ;;  %v454_v7 = vpop.f32.mrf.mxu1 }
  0xf4   :  { %v218_v53 = vpop.f32.mrf.mxu0  ;;  %1019 = vmatmul.mubr.bf16.gmra.mxu0 %v252_v51 }
  0xf5   :  { %v992_v8 = vpop.f32.mrf.mxu1 }
  0xf6   :  { %v961_v54 = vpop.f32.mrf.mxu0 }
  0xf7   :  { %v254_v57 = vpack.c.bf16 %v961_v54, %v960_v52  ;;  %v467_v9 = vpop.f32.mrf.mxu1 }
  0xf8   :  { %v221_v55 = vpop.f32.mrf.mxu0 }
  0xf9   :  { %v253_v56 = vpack.c.bf16 %v221_v55, %v218_v53  ;;  %v993_v10 = vpop.f32.mrf.mxu1 }
  0xfa   :  { %v964_v58 = vpop.f32.mrf.mxu0 }
  0xfb   :  { %1022 = vmatprep.mubr.bf16.mxu1 %v253_v56  ;;  %v470_v11 = vpop.f32.mrf.mxu1 }
  0xfc   :  { %v234_v59 = vpop.f32.mrf.mxu0  ;;  %1023 = vmatmul.mubr.bf16.vlgmr.msra.gmra.mxu1 %v254_v57 }
  0xfd   :  { %v996_v15 = vpop.f32.mrf.mxu1 }
  0xfe   :  { %v965_v60 = vpop.f32.mrf.mxu0 }
  0xff   :  { %v256_v63 = vpack.c.bf16 %v965_v60, %v964_v58  ;;  %v483_v21 = vpop.f32.mrf.mxu1 }
 0x100   :  { %v237_v61 = vpop.f32.mrf.mxu0 }
 0x101   :  { %v255_v62 = vpack.c.bf16 %v237_v61, %v234_v59  ;;  %v997_v31 = vpop.f32.mrf.mxu1 }
 0x103   :  { %1026 = vmatprep.mubr.bf16.mxu1 %v255_v62  ;;  %v486_v41 = vpop.f32.mrf.mxu1 }
 0x104   :  { %1027 = vmatmul.mubr.bf16.gmra.mxu1 %v256_v63 }
 0x1ac   :  { %v1016_v12 = vpop.f32.mrf.mxu0 }
 0x1ad   :  { %v589_v13 = vadd.f32 %v1016_v12, %v984_v0 }
 0x1ae   :  { %v580_v16 = vpop.f32.mrf.mxu0 }
 0x1af   :  { %v581_v17 = vadd.f32 %v580_v16, %v435_v1  ;;  %v652_v19 = vadd.f32 %v1244_v14, %v589_v13 }
 0x1b0   :  { %v1017_v18 = vpop.f32.mrf.mxu0 }
 0x1b1   :  { %v592_v20 = vadd.f32 %v1017_v18, %v985_v2  ;;  %v650_v23 = vadd.f32 %v1244_v14, %v581_v17  ;;  %v668_v27 = vmax.f32 %v652_v19, 0.0 }
 0x1b2   :  { %v583_v22 = vpop.f32.mrf.mxu0 }
 0x1b3   :  { %v653_v24 = vadd.f32 %v1244_v14, %v592_v20  ;;  %v584_v25 = vadd.f32 %v583_v22, %v438_v3  ;;  %v666_v33 = vmax.f32 %v650_v23, 0.0 }
 0x1b4   :  { %v1020_v26 = vpop.f32.mrf.mxu0 }
 0x1b5   :  { %v669_v28 = vmax.f32 %v653_v24, 0.0  ;;  %v651_v29 = vadd.f32 %v1244_v14, %v584_v25  ;;  %v605_v30 = vadd.f32 %v1020_v26, %v988_v4 }
 0x1b6   :  { %v596_v32 = vpop.f32.mrf.mxu0 }
 0x1b7   :  { %v847_v34 = vpack.c.bf16 %v669_v28, %v668_v27  ;;  %v667_v35 = vmax.f32 %v651_v29, 0.0  ;;  %v597_v36 = vadd.f32 %v596_v32, %v451_v5  ;;  %v656_v39 = vadd.f32 %v1244_v14, %v605_v30 }
 0x1b8   :  { %v1021_v37 = vpop.f32.mrf.mxu0 }
 0x1b9   :  { %879 = vst [vmem:[%s1292_s6 + $0x8] sm:$0xff] %v847_v34   ;;  %v842_v38 = vpack.c.bf16 %v667_v35, %v666_v33  ;;  %v608_v40 = vadd.f32 %v1021_v37, %v989_v6  ;;  %v654_v43 = vadd.f32 %v1244_v14, %v597_v36  ;;  %v672_v47 = vmax.f32 %v656_v39, 0.0 }
 0x1ba   :  { %v599_v42 = vpop.f32.mrf.mxu0 }
 0x1bb   :  { %843 = vst [vmem:[%s1292_s6] sm:$0xff] %v842_v38   ;;  %v657_v44 = vadd.f32 %v1244_v14, %v608_v40  ;;  %v600_v45 = vadd.f32 %v599_v42, %v454_v7  ;;  %v670_v52 = vmax.f32 %v654_v43, 0.0 }
 0x1bc   :  { %v1024_v46 = vpop.f32.mrf.mxu1 }
 0x1bd   :  { %v673_v48 = vmax.f32 %v657_v44, 0.0  ;;  %v655_v49 = vadd.f32 %v1244_v14, %v600_v45  ;;  %v621_v50 = vadd.f32 %v1024_v46, %v992_v8 }
 0x1be   :  { %v612_v51 = vpop.f32.mrf.mxu1 }
 0x1bf   :  { %v857_v53 = vpack.c.bf16 %v673_v48, %v672_v47  ;;  %v671_v54 = vmax.f32 %v655_v49, 0.0  ;;  %v613_v55 = vadd.f32 %v612_v51, %v467_v9  ;;  %v660_v58 = vadd.f32 %v1244_v14, %v621_v50 }
 0x1c0   :  { %v1025_v56 = vpop.f32.mrf.mxu1 }
 0x1c1   :  { %881 = vst [vmem:[%s1292_s6 + $0x18] sm:$0xff] %v857_v53   ;;  %v852_v57 = vpack.c.bf16 %v671_v54, %v670_v52  ;;  %v624_v59 = vadd.f32 %v1025_v56, %v993_v10  ;;  %v658_v61 = vadd.f32 %v1244_v14, %v613_v55  ;;  %v676_v1 = vmax.f32 %v660_v58, 0.0 }
 0x1c2   :  { %v615_v60 = vpop.f32.mrf.mxu1 }
 0x1c3   :  { %880 = vst [vmem:[%s1292_s6 + $0x10] sm:$0xff] %v852_v57   ;;  %v661_v62 = vadd.f32 %v1244_v14, %v624_v59  ;;  %v616_v63 = vadd.f32 %v615_v60, %v470_v11  ;;  %v674_v6 = vmax.f32 %v658_v61, 0.0 }
 0x1c4   :  { %v1028_v0 = vpop.f32.mrf.mxu1 }
 0x1c5   :  { %v677_v2 = vmax.f32 %v661_v62, 0.0  ;;  %v659_v3 = vadd.f32 %v1244_v14, %v616_v63  ;;  %v637_v4 = vadd.f32 %v1028_v0, %v996_v15 }
 0x1c6   :  { %v628_v5 = vpop.f32.mrf.mxu1 }
 0x1c7   :  { %v867_v7 = vpack.c.bf16 %v677_v2, %v676_v1  ;;  %v675_v8 = vmax.f32 %v659_v3, 0.0  ;;  %v629_v9 = vadd.f32 %v628_v5, %v483_v21  ;;  %v664_v13 = vadd.f32 %v1244_v14, %v637_v4 }
 0x1c8   :  { %v1029_v10 = vpop.f32.mrf.mxu1 }
 0x1c9   :  { %883 = vst [vmem:[%s1292_s6 + $0x28] sm:$0xff] %v867_v7   ;;  %v862_v12 = vpack.c.bf16 %v675_v8, %v674_v6  ;;  %v640_v11 = vadd.f32 %v1029_v10, %v997_v31  ;;  %v662_v15 = vadd.f32 %v1244_v14, %v629_v9  ;;  %v680_v19 = vmax.f32 %v664_v13, 0.0 }
 0x1ca   :  { %v631_v16 = vpop.f32.mrf.mxu1 }
 0x1cb   :  { %882 = vst [vmem:[%s1292_s6 + $0x20] sm:$0xff] %v862_v12   ;;  %v665_v17 = vadd.f32 %v1244_v14, %v640_v11  ;;  %v632_v18 = vadd.f32 %v631_v16, %v486_v41  ;;  %v678_v22 = vmax.f32 %v662_v15, 0.0 }
 0x1cd   :  { %v681_v20 = vmax.f32 %v665_v17, 0.0  ;;  %v663_v21 = vadd.f32 %v1244_v14, %v632_v18 }
 0x1cf   :  { %v877_v23 = vpack.c.bf16 %v681_v20, %v680_v19  ;;  %v679_v24 = vmax.f32 %v663_v21, 0.0 }
 0x1d1   :  { %885 = vst [vmem:[%s1292_s6 + $0x38] sm:$0xff] %v877_v23   ;;  %v872_v25 = vpack.c.bf16 %v679_v24, %v678_v22 }
 0x1d3   :  { %884 = vst [vmem:[%s1292_s6 + $0x30] sm:$0xff] %v872_v25  }

// kernel: sage_gnn_forward.4
= control target key start
LH: loop header
LB: loop body
LE: loop exit
PB: predicated region body
PF: predicated region fallthrough
CT: control target
= control target key end

     0   :  { %vm857_vm0 = vcmask 7168   ;;  %s2032_s1 = inlined_call_operand.vmem [shape: bf16[128,128], index: 1, kind: input, shape index: {}, may-alias: {1,2}]   ;;  %s2033_s0 = inlined_call_operand.vmem [shape: bf16[128,128], index: 0, kind: input, shape index: {}]   ;;  %s2034_s4 = inlined_call_operand.vmem [shape: bf16[128,128], index: 4, kind: input, shape index: {}]   ;;  %s2035_s3 = inlined_call_operand.vmem [shape: bf16[128,128], index: 3, kind: input, shape index: {}]   ;;  %s2036_s2 = inlined_call_operand.vmem [shape: bf16[128,128], index: 2, kind: input, shape index: {}, may-alias: {1,2}]   ;;  %s2037_s6 = inlined_call_operand.vmem [shape: f32[128,1], index: 6, kind: input, shape index: {}]   ;;  %s2038_s7 = inlined_call_operand.vmem [shape: f32[128,1], index: 7, kind: input, shape index: {}]   ;;  %s2039_s5 = inlined_call_operand.vmem [shape: f32[1,128], index: 5, kind: input, shape index: {}]   ;;  %s2040_s8 = inlined_call_operand.<no memory space> [shape: f32[1], index: 8, kind: input, shape index: {}]   ;;  %s2041_s10 = inlined_call_operand.vmem [shape: f32[128,1], index: 10, kind: output, shape index: {1}]   ;;  %s2042_s9 = inlined_call_operand.vmem [shape: f32[128,1], index: 9, kind: output, shape index: {0}]  }
   0x1   :  { %v1452_v0 = vld [vmem:[%s2032_s1 + $0x38] sm:$0xff]   ;;  %v1453_v1 = vld [vmem:[%s2032_s1 + $0x30] sm:$0xff]   ;;  %v1454_v2 = vld [vmem:[%s2032_s1 + $0x28] sm:$0xff]  }
   0x2   :  { %1212 = vmatprep.subr.bf16.mxu0 %v1452_v0  ;;  %v1455_v3 = vld [vmem:[%s2032_s1 + $0x20] sm:$0xff]   ;;  %v1456_v5 = vld [vmem:[%s2032_s1 + $0x18] sm:$0xff]   ;;  %v1457_v6 = vld [vmem:[%s2032_s1 + $0x10] sm:$0xff]  }
   0x3   :  { %1213 = vmatpush3.bf16.msra.mxu0 %v1452_v0  ;;  %v1460_v4 = vld [vmem:[%s2033_s0] sm:$0xff]   ;;  %v1468_v7 = vld [vmem:[%s2034_s4 + $0x38] sm:$0xff]   ;;  %v1469_v8 = vld [vmem:[%s2034_s4 + $0x30] sm:$0xff]  }
   0x4   :  { %1214 = vmatprep.subr.bf16.mxu0 %v1453_v1  ;;  %1228 = vmatprep.mubr.bf16.mxu0 %v1460_v4  ;;  %v1458_v9 = vld [vmem:[%s2032_s1 + $0x8] sm:$0xff]   ;;  %v1459_v11 = vld [vmem:[%s2032_s1] sm:$0xff]   ;;  %v1470_v13 = vld [vmem:[%s2035_s3 + $0x38] sm:$0xff]  }
   0x5   :  { %1244 = vmatprep.subr.bf16.mxu1 %v1468_v7  ;;  %v1471_v10 = vld [vmem:[%s2034_s4 + $0x28] sm:$0xff]   ;;  %v1473_v12 = vld [vmem:[%s2034_s4 + $0x20] sm:$0xff]   ;;  %v1475_v15 = vld [vmem:[%s2034_s4 + $0x18] sm:$0xff]  }
   0x6   :  { %1245 = vmatpush3.bf16.msra.mxu1 %v1468_v7  ;;  %v1461_v14 = vld [vmem:[%s2033_s0 + $0x8] sm:$0xff]   ;;  %v1462_v16 = vld [vmem:[%s2033_s0 + $0x10] sm:$0xff]   ;;  %v1463_v21 = vld [vmem:[%s2033_s0 + $0x18] sm:$0xff]  }
   0x7   :  { %1215 = vmatpush3.bf16.msra.mxu0 %v1453_v1  ;;  %1246 = vmatprep.subr.bf16.mxu1 %v1469_v8  ;;  %v1472_v17 = vld [vmem:[%s2035_s3 + $0x30] sm:$0xff]   ;;  %v1474_v19 = vld [vmem:[%s2035_s3 + $0x28] sm:$0xff]   ;;  %v1464_v22 = vld [vmem:[%s2033_s0 + $0x20] sm:$0xff]  }
   0x8   :  { %1216 = vmatprep.subr.bf16.mxu0 %v1454_v2  ;;  %v1477_v18 = vld [vmem:[%s2034_s4 + $0x10] sm:$0xff]   ;;  %v1479_v20 = vld [vmem:[%s2034_s4 + $0x8] sm:$0xff]   ;;  %v1476_v23 = vld [vmem:[%s2035_s3 + $0x20] sm:$0xff]  }
   0x9   :  { %v1478_v24 = vld [vmem:[%s2035_s3 + $0x18] sm:$0xff]   ;;  %v1465_v25 = vld [vmem:[%s2033_s0 + $0x28] sm:$0xff]   ;;  %v1466_v26 = vld [vmem:[%s2033_s0 + $0x30] sm:$0xff]  }
   0xa   :  { %1247 = vmatpush3.bf16.msra.mxu1 %v1469_v8  ;;  %v1480_v27 = vld [vmem:[%s2035_s3 + $0x10] sm:$0xff]   ;;  %v1467_v28 = vld [vmem:[%s2033_s0 + $0x38] sm:$0xff]   ;;  %v1481_v29 = vld [vmem:[%s2034_s4] sm:$0xff]  }
   0xb   :  { %1217 = vmatpush3.bf16.msra.mxu0 %v1454_v2  ;;  %1248 = vmatprep.subr.bf16.mxu1 %v1471_v10  ;;  %v1482_v30 = vld [vmem:[%s2035_s3 + $0x8] sm:$0xff]   ;;  %v1483_v31 = vld [vmem:[%s2036_s2] sm:$0xff]   ;;  %v1486_v34 = vld [vmem:[%s2036_s2 + $0x10] sm:$0xff]  }
   0xc   :  { %1218 = vmatprep.subr.bf16.mxu0 %v1455_v3  ;;  %v1484_v32 = vld [vmem:[%s2036_s2 + $0x8] sm:$0xff]   ;;  %1260 = vmatprep.mubr.bf16.mxu1 %v1483_v31  ;;  %v1485_v33 = vld [vmem:[%s2035_s3] sm:$0xff]   ;;  %v1487_v35 = vld [vmem:[%s2036_s2 + $0x18] sm:$0xff]  }
   0xd   :  { %v1488_v36 = vld [vmem:[%s2036_s2 + $0x20] sm:$0xff]   ;;  %v1489_v37 = vld [vmem:[%s2036_s2 + $0x28] sm:$0xff]   ;;  %v1490_v38 = vld [vmem:[%s2036_s2 + $0x30] sm:$0xff]  }
   0xe   :  { %1249 = vmatpush3.bf16.msra.mxu1 %v1471_v10  ;;  %v1491_v39 = vld [vmem:[%s2036_s2 + $0x38] sm:$0xff]   ;;  %v709_v42 = vld [vmem:[%s2037_s6 + $0x70] sm:$0xff]  ;;  %v708_v43 = vld [vmem:[%s2037_s6 + $0x68] sm:$0xff] }
   0xf   :  { %1219 = vmatpush3.bf16.msra.mxu0 %v1455_v3  ;;  %1250 = vmatprep.subr.bf16.mxu1 %v1473_v12  ;;  %v710_v40 = vld [vmem:[%s2037_s6 + $0x78] sm:$0xff]  ;;  %v707_v44 = vld [vmem:[%s2037_s6 + $0x60] sm:$0xff]  ;;  %v705_v46 = vld [vmem:[%s2037_s6 + $0x50] sm:$0xff] }
  0x10   :  { %1220 = vmatprep.subr.bf16.mxu0 %v1456_v5  ;;  %v1673_v41 = vld [vmem:[%s2038_s7 + $0x78] sm:$0xff]  ;;  %v704_v47 = vld [vmem:[%s2037_s6 + $0x48] sm:$0xff]  ;;  %v703_v48 = vld [vmem:[%s2037_s6 + $0x40] sm:$0xff] }
  0x11   :  { %v706_v45 = vld [vmem:[%s2037_s6 + $0x58] sm:$0xff]  ;;  %v701_v50 = vld [vmem:[%s2037_s6 + $0x30] sm:$0xff]  ;;  %v1712_v60 = vld [vmem:[%s2038_s7 + $0x68] sm:$0xff] }
  0x12   :  { %1251 = vmatpush3.bf16.msra.mxu1 %v1473_v12  ;;  %v702_v49 = vld [vmem:[%s2037_s6 + $0x38] sm:$0xff]  ;;  %v1706_v58 = vld [vmem:[%s2038_s7 + $0x70] sm:$0xff]  ;;  %v1719_v62 = vld [vmem:[%s2038_s7 + $0x60] sm:$0xff] }
  0x13   :  { %1221 = vmatpush3.bf16.msra.mxu0 %v1456_v5  ;;  %1252 = vmatprep.subr.bf16.mxu1 %v1475_v15  ;;  %v1726_v1 = vld [vmem:[%s2038_s7 + $0x58] sm:$0xff]  ;;  %v1733_v4 = vld [vmem:[%s2038_s7 + $0x50] sm:$0xff]  ;;  %v1747_v8 = vld [vmem:[%s2038_s7 + $0x40] sm:$0xff] }
  0x14   :  { %1222 = vmatprep.subr.bf16.mxu0 %v1457_v6  ;;  %v1823_v31 = vld [vmem:[%s2038_s7] sm:$0xff] }
  0x16   :  { %1253 = vmatpush3.bf16.msra.mxu1 %v1475_v15 }
  0x17   :  { %1223 = vmatpush3.bf16.msra.mxu0 %v1457_v6  ;;  %1254 = vmatprep.subr.bf16.mxu1 %v1477_v18  ;;  %v1740_v6 = vld [vmem:[%s2038_s7 + $0x48] sm:$0xff] }
  0x18   :  { %1224 = vmatprep.subr.bf16.mxu0 %v1458_v9 }
  0x1a   :  { %1255 = vmatpush3.bf16.msra.mxu1 %v1477_v18 }
  0x1b   :  { %1225 = vmatpush3.bf16.msra.mxu0 %v1458_v9  ;;  %1256 = vmatprep.subr.bf16.mxu1 %v1479_v20 }
  0x1c   :  { %1226 = vmatprep.subr.bf16.mxu0 %v1459_v11 }
  0x1e   :  { %1257 = vmatpush3.bf16.msra.mxu1 %v1479_v20  ;;  %v700_v20 = vld [vmem:[%s2037_s6 + $0x28] sm:$0xff] }
  0x1f   :  { %1227 = vmatpush3.bf16.msra.mxu0 %v1459_v11  ;;  %1258 = vmatprep.subr.bf16.mxu1 %v1481_v29  ;;  %v1754_v11 = vld [vmem:[%s2038_s7 + $0x38] sm:$0xff] }
  0x20   :  { %1276 = vmatprep.subr.bf16.mxu0 %v1470_v13 }
  0x22   :  { %1229 = vmatmul.mubr.bf16.vlgmr.msra.gmra.mxu0 %v1461_v14  ;;  %1259 = vmatpush3.bf16.msra.mxu1 %v1481_v29  ;;  %v1761_v14 = vld [vmem:[%s2038_s7 + $0x30] sm:$0xff]  ;;  %v1813_v29 = vld [vmem:[%s2038_s7 + $0x8] sm:$0xff] }
  0x23   :  { %1232 = vmatprep.mubr.bf16.mxu0 %v1462_v16  ;;  %1277 = vmatpush3.bf16.msra.mxu0 %v1470_v13 }
  0x24   :  { %1278 = vmatprep.subr.bf16.mxu0 %v1472_v17  ;;  %1308 = vmatprep.subr.mxu1 %v710_v40 }
  0x25   :  { %1261 = vmatmul.mubr.bf16.vlgmr.msra.gmra.mxu1 %v1484_v32 }
  0x26   :  { %1264 = vmatprep.mubr.bf16.mxu1 %v1486_v34  ;;  %1309 = vmatpush3.msra.mxu1 %v710_v40 }
  0x27   :  { %1279 = vmatpush3.bf16.msra.mxu0 %v1472_v17  ;;  %1310 = vmatprep.subr.mxu1 %v709_v42 }
  0x28   :  { %1280 = vmatprep.subr.bf16.mxu0 %v1474_v19  ;;  %1311 = vmatpush3.msra.mxu1 %v709_v42 }
  0x29   :  { %1312 = vmatprep.subr.mxu1 %v708_v43 }
  0x2a   :  { %1233 = vmatmul.mubr.bf16.gmra.mxu0 %v1463_v21  ;;  %1313 = vmatpush3.msra.mxu1 %v708_v43  ;;  %v1773_v21 = vld [vmem:[%s2038_s7 + $0x28] sm:$0xff] }
  0x2b   :  { %1236 = vmatprep.mubr.bf16.mxu0 %v1464_v22  ;;  %1281 = vmatpush3.bf16.msra.mxu0 %v1474_v19  ;;  %v699_v22 = vld [vmem:[%s2037_s6 + $0x20] sm:$0xff] }
  0x2c   :  { %1282 = vmatprep.subr.bf16.mxu0 %v1476_v23  ;;  %1314 = vmatprep.subr.mxu1 %v707_v44 }
  0x2d   :  { %1265 = vmatmul.mubr.bf16.gmra.mxu1 %v1487_v35 }
  0x2e   :  { %1268 = vmatprep.mubr.bf16.mxu1 %v1488_v36  ;;  %1315 = vmatpush3.msra.mxu1 %v707_v44 }
  0x2f   :  { %1283 = vmatpush3.bf16.msra.mxu0 %v1476_v23  ;;  %1316 = vmatprep.subr.mxu1 %v706_v45  ;;  %v1783_v23 = vld [vmem:[%s2038_s7 + $0x20] sm:$0xff] }
  0x30   :  { %1284 = vmatprep.subr.bf16.mxu0 %v1478_v24  ;;  %1317 = vmatpush3.msra.mxu1 %v706_v45 }
  0x31   :  { %1318 = vmatprep.subr.mxu1 %v705_v46 }
  0x32   :  { %1237 = vmatmul.mubr.bf16.gmra.mxu0 %v1465_v25  ;;  %1319 = vmatpush3.msra.mxu1 %v705_v46  ;;  %v1793_v25 = vld [vmem:[%s2038_s7 + $0x18] sm:$0xff]  ;;  %v1831_v46 = vld [vmem:[%s2039_s5] ss:$0 sm:$0xff] }
  0x33   :  { %1240 = vmatprep.mubr.bf16.mxu0 %v1466_v26  ;;  %1285 = vmatpush3.bf16.msra.mxu0 %v1478_v24  ;;  %v698_v24 = vld [vmem:[%s2037_s6 + $0x18] sm:$0xff]  ;;  %v697_v26 = vld [vmem:[%s2037_s6 + $0x10] sm:$0xff] }
  0x34   :  { %1286 = vmatprep.subr.bf16.mxu0 %v1480_v27  ;;  %1320 = vmatprep.subr.mxu1 %v704_v47 }
  0x35   :  { %1269 = vmatmul.mubr.bf16.gmra.mxu1 %v1489_v37 }
  0x36   :  { %1272 = vmatprep.mubr.bf16.mxu1 %v1490_v38  ;;  %1321 = vmatpush3.msra.mxu1 %v704_v47 }
  0x37   :  { %1287 = vmatpush3.bf16.msra.mxu0 %v1480_v27  ;;  %1322 = vmatprep.subr.mxu1 %v703_v48  ;;  %v1803_v27 = vld [vmem:[%s2038_s7 + $0x10] sm:$0xff] }
  0x38   :  { %1288 = vmatprep.subr.bf16.mxu0 %v1482_v30  ;;  %1323 = vmatpush3.msra.mxu1 %v703_v48 }
  0x39   :  { %1324 = vmatprep.subr.mxu1 %v702_v49 }
  0x3a   :  { %1241 = vmatmul.mubr.bf16.gmra.mxu0 %v1467_v28  ;;  %1325 = vmatpush3.msra.mxu1 %v702_v49  ;;  %v696_v28 = vld [vmem:[%s2037_s6 + $0x8] sm:$0xff] }
  0x3b   :  { %1289 = vmatpush3.bf16.msra.mxu0 %v1482_v30  ;;  %1326 = vmatprep.subr.mxu1 %v701_v50  ;;  %v695_v30 = vld [vmem:[%s2037_s6] sm:$0xff] }
  0x3c   :  { %1290 = vmatprep.subr.bf16.mxu0 %v1485_v33  ;;  %1327 = vmatpush3.msra.mxu1 %v701_v50 }
  0x3d   :  { %1273 = vmatmul.mubr.bf16.gmra.mxu1 %v1491_v39  ;;  %1328 = vmatprep.subr.mxu1 %v700_v20 }
  0x3e   :  { %1329 = vmatpush3.msra.mxu1 %v700_v20 }
  0x3f   :  { %1291 = vmatpush3.bf16.msra.mxu0 %v1485_v33  ;;  %1330 = vmatprep.subr.mxu1 %v699_v22 }
  0x40   :  { %1364 = vmatprep.subr.mxu0 %v1673_v41  ;;  %1331 = vmatpush3.msra.mxu1 %v699_v22 }
  0x41   :  { %1332 = vmatprep.subr.mxu1 %v698_v24 }
  0x42   :  { %1333 = vmatpush3.msra.mxu1 %v698_v24 }
  0x43   :  { %1334 = vmatprep.subr.mxu1 %v697_v26 }
  0x44   :  { %1335 = vmatpush3.msra.mxu1 %v697_v26 }
  0x45   :  { %1336 = vmatprep.subr.mxu1 %v696_v28 }
  0x46   :  { %1337 = vmatpush3.msra.mxu1 %v696_v28 }
  0x47   :  { %1338 = vmatprep.subr.mxu1 %v695_v30 }
  0x48   :  { %1339 = vmatpush3.msra.mxu1 %v695_v30 }
  0x49   :  { %1420 = vmatprep.subr.mxu1 %v1673_v41 }
  0xe2   :  { %v1230_v51 = vpop.f32.mrf.mxu0 }
  0xe4   :  { %v198_v52 = vpop.f32.mrf.mxu0 }
  0xe5   :  { %v1262_v32 = vpop.f32.mrf.mxu1 }
  0xe6   :  { %v1231_v53 = vpop.f32.mrf.mxu0 }
  0xe7   :  { %v262_v56 = vpack.c.bf16 %v1231_v53, %v1230_v51  ;;  %v447_v33 = vpop.f32.mrf.mxu1 }
  0xe8   :  { %v201_v54 = vpop.f32.mrf.mxu0 }
  0xe9   :  { %v261_v55 = vpack.c.bf16 %v201_v54, %v198_v52  ;;  %v1263_v34 = vpop.f32.mrf.mxu1 }
  0xea   :  { %v1234_v57 = vpop.f32.mrf.mxu0 }
  0xeb   :  { %1292 = vmatprep.mubr.bf16.mxu0 %v261_v55  ;;  %v450_v35 = vpop.f32.mrf.mxu1 }
  0xec   :  { %v214_v59 = vpop.f32.mrf.mxu0  ;;  %1293 = vmatmul.mubr.bf16.vlgmr.msra.gmra.mxu0 %v262_v56 }
  0xed   :  { %1365 = vmatpush3.msra.mxu0 %v1673_v41  ;;  %v1266_v36 = vpop.f32.mrf.mxu1 }
  0xee   :  { %v1235_v61 = vpop.f32.mrf.mxu0  ;;  %1366 = vmatprep.subr.mxu0 %v1706_v58 }
  0xef   :  { %1367 = vmatpush3.msra.mxu0 %v1706_v58  ;;  %v264_v2 = vpack.c.bf16 %v1235_v61, %v1234_v57  ;;  %v463_v37 = vpop.f32.mrf.mxu1 }
  0xf0   :  { %v217_v63 = vpop.f32.mrf.mxu0  ;;  %1368 = vmatprep.subr.mxu0 %v1712_v60 }
  0xf1   :  { %v263_v0 = vpack.c.bf16 %v217_v63, %v214_v59  ;;  %1369 = vmatpush3.msra.mxu0 %v1712_v60  ;;  %v1267_v38 = vpop.f32.mrf.mxu1 }
  0xf2   :  { %v1238_v3 = vpop.f32.mrf.mxu0  ;;  %1370 = vmatprep.subr.mxu0 %v1719_v62 }
  0xf3   :  { %1296 = vmatprep.mubr.bf16.mxu0 %v263_v0  ;;  %1371 = vmatpush3.msra.mxu0 %v1719_v62  ;;  %v466_v39 = vpop.f32.mrf.mxu1 }
  0xf4   :  { %v230_v5 = vpop.f32.mrf.mxu0  ;;  %1297 = vmatmul.mubr.bf16.gmra.mxu0 %v264_v2  ;;  %1372 = vmatprep.subr.mxu0 %v1726_v1 }
  0xf5   :  { %1373 = vmatpush3.msra.mxu0 %v1726_v1  ;;  %v1270_v43 = vpop.f32.mrf.mxu1 }
  0xf6   :  { %v1239_v7 = vpop.f32.mrf.mxu0  ;;  %1374 = vmatprep.subr.mxu0 %v1733_v4 }
  0xf7   :  { %1375 = vmatpush3.msra.mxu0 %v1733_v4  ;;  %v266_v12 = vpack.c.bf16 %v1239_v7, %v1238_v3  ;;  %v479_v50 = vpop.f32.mrf.mxu1 }
  0xf8   :  { %v233_v9 = vpop.f32.mrf.mxu0  ;;  %1376 = vmatprep.subr.mxu0 %v1740_v6 }
  0xf9   :  { %v265_v10 = vpack.c.bf16 %v233_v9, %v230_v5  ;;  %1377 = vmatpush3.msra.mxu0 %v1740_v6  ;;  %v1271_v59 = vpop.f32.mrf.mxu1 }
  0xfa   :  { %v1242_v13 = vpop.f32.mrf.mxu0  ;;  %1378 = vmatprep.subr.mxu0 %v1747_v8 }
  0xfb   :  { %1300 = vmatprep.mubr.bf16.mxu0 %v265_v10  ;;  %1379 = vmatpush3.msra.mxu0 %v1747_v8  ;;  %v482_v10 = vpop.f32.mrf.mxu1 }
  0xfc   :  { %v246_v15 = vpop.f32.mrf.mxu0  ;;  %1301 = vmatmul.mubr.bf16.gmra.mxu0 %v266_v12  ;;  %1380 = vmatprep.subr.mxu0 %v1754_v11 }
  0xfd   :  { %1381 = vmatpush3.msra.mxu0 %v1754_v11 }
  0xfe   :  { %v1243_v16 = vpop.f32.mrf.mxu0  ;;  %1382 = vmatprep.subr.mxu0 %v1761_v14 }
  0xff   :  { %1383 = vmatpush3.msra.mxu0 %v1761_v14  ;;  %v268_v19 = vpack.c.bf16 %v1243_v16, %v1242_v13 }
 0x100   :  { %v249_v17 = vpop.f32.mrf.mxu0  ;;  %1384 = vmatprep.subr.mxu0 %v1773_v21 }
 0x101   :  { %v267_v18 = vpack.c.bf16 %v249_v17, %v246_v15  ;;  %1385 = vmatpush3.msra.mxu0 %v1773_v21 }
 0x102   :  { %1386 = vmatprep.subr.mxu0 %v1783_v23 }
 0x103   :  { %1304 = vmatprep.mubr.bf16.mxu0 %v267_v18  ;;  %1387 = vmatpush3.msra.mxu0 %v1783_v23 }
 0x104   :  { %1305 = vmatmul.mubr.bf16.gmra.mxu0 %v268_v19  ;;  %1388 = vmatprep.subr.mxu0 %v1793_v25 }
 0x105   :  { %1389 = vmatpush3.msra.mxu0 %v1793_v25 }
 0x106   :  { %1390 = vmatprep.subr.mxu0 %v1803_v27 }
 0x107   :  { %1391 = vmatpush3.msra.mxu0 %v1803_v27 }
 0x108   :  { %1392 = vmatprep.subr.mxu0 %v1813_v29 }
 0x109   :  { %1393 = vmatpush3.msra.mxu0 %v1813_v29 }
 0x10a   :  { %1394 = vmatprep.subr.mxu0 %v1823_v31 }
 0x10b   :  { %1395 = vmatpush3.msra.mxu0 %v1823_v31 }
 0x1ac   :  { %v1294_v40 = vpop.f32.mrf.mxu0 }
 0x1ad   :  { %v601_v45 = vadd.f32 %v1294_v40, %v1262_v32 }
 0x1ae   :  { %v592_v42 = vpop.f32.mrf.mxu0 }
 0x1af   :  { %v593_v44 = vadd.f32 %v592_v42, %v447_v33  ;;  %v664_v54 = vadd.f32 %v1831_v46, %v601_v45 }
 0x1b0   :  { %v1295_v47 = vpop.f32.mrf.mxu0 }
 0x1b1   :  { %v662_v48 = vadd.f32 %v1831_v46, %v593_v44  ;;  %v604_v52 = vadd.f32 %v1295_v47, %v1263_v34  ;;  %v680_v2 = vmax.f32 %v664_v54, 0.0 }
 0x1b2   :  { %v595_v49 = vpop.f32.mrf.mxu0 }
 0x1b3   :  { %v678_v51 = vmax.f32 %v662_v48, 0.0  ;;  %v596_v53 = vadd.f32 %v595_v49, %v450_v35  ;;  %v665_v61 = vadd.f32 %v1831_v46, %v604_v52 }
 0x1b4   :  { %v1298_v55 = vpop.f32.mrf.mxu0 }
 0x1b5   :  { %v663_v56 = vadd.f32 %v1831_v46, %v596_v53  ;;  %1340 = vmatprep.mubr.f32.mxu1 %v678_v51  ;;  %1396 = vmatprep.mubr.f32.mxu0 %v678_v51  ;;  %v617_v5 = vadd.f32 %v1298_v55, %v1266_v36  ;;  %v681_v12 = vmax.f32 %v665_v61, 0.0 }
 0x1b6   :  { %v608_v57 = vpop.f32.mrf.mxu0 }
 0x1b7   :  { %v679_v63 = vmax.f32 %v663_v56, 0.0  ;;  %v609_v0 = vadd.f32 %v608_v57, %v463_v37  ;;  %v668_v18 = vadd.f32 %v1831_v46, %v617_v5 }
 0x1b8   :  { %v1299_v3 = vpop.f32.mrf.mxu0 }
 0x1b9   :  { %v666_v7 = vadd.f32 %v1831_v46, %v609_v0  ;;  %1341 = vmatmul.mubr.f32.vlgmr.msra.gmra.mxu1 %v679_v63  ;;  %1397 = vmatmul.mubr.f32.vlgmr.msra.gmra.mxu0 %v679_v63  ;;  %v620_v15 = vadd.f32 %v1299_v3, %v1267_v38  ;;  %v684_v30 = vmax.f32 %v668_v18, 0.0 }
 0x1ba   :  { %1436 = vmatpush3.msra.mxu1 %v1673_v41  ;;  %v611_v9 = vpop.f32.mrf.mxu0  ;;  %1343 = vmatprep.mubr.f32.mxu1 %v680_v2  ;;  %v1274_v41 = vpop.f32.mrf.mxu1 }
 0x1bb   :  { %v682_v13 = vmax.f32 %v666_v7, 0.0  ;;  %v612_v16 = vadd.f32 %v611_v9, %v466_v39  ;;  %1421 = vmatprep.subr.mxu1 %v1706_v58  ;;  %1399 = vmatprep.mubr.f32.mxu0 %v680_v2  ;;  %v669_v22 = vadd.f32 %v1831_v46, %v620_v15 }
 0x1bc   :  { %1437 = vmatpush3.msra.mxu1 %v1706_v58  ;;  %v1302_v17 = vpop.f32.mrf.mxu0 }
 0x1bd   :  { %v667_v19 = vadd.f32 %v1831_v46, %v612_v16  ;;  %1422 = vmatprep.subr.mxu1 %v1712_v60  ;;  %1344 = vmatmul.mubr.f32.gmra.mxu1 %v681_v12  ;;  %v633_v58 = vadd.f32 %v1302_v17, %v1270_v43  ;;  %v685_v34 = vmax.f32 %v669_v22, 0.0 }
 0x1be   :  { %1438 = vmatpush3.msra.mxu1 %v1712_v60  ;;  %1400 = vmatmul.mubr.f32.gmra.mxu0 %v681_v12  ;;  %v624_v20 = vpop.f32.mrf.mxu0  ;;  %v495_v60 = vpop.f32.mrf.mxu1 }
 0x1bf   :  { %v683_v24 = vmax.f32 %v667_v19, 0.0  ;;  %v625_v26 = vadd.f32 %v624_v20, %v479_v50  ;;  %1346 = vmatprep.mubr.f32.mxu1 %v682_v13  ;;  %1423 = vmatprep.subr.mxu1 %v1719_v62 }
 0x1c0   :  { %1402 = vmatprep.mubr.f32.mxu0 %v682_v13  ;;  %1439 = vmatpush3.msra.mxu1 %v1719_v62  ;;  %v1303_v28 = vpop.f32.mrf.mxu0  ;;  %v672_v62 = vadd.f32 %v1831_v46, %v633_v58 }
 0x1c1   :  { %v1849_v32 = vadd.f32 %v1831_v46, %v625_v26  ;;  %1424 = vmatprep.subr.mxu1 %v1726_v1  ;;  %1347 = vmatmul.mubr.f32.gmra.mxu1 %v683_v24  ;;  %v636_v36 = vadd.f32 %v1303_v28, %v1271_v59 }
 0x1c2   :  { %1440 = vmatpush3.msra.mxu1 %v1726_v1  ;;  %1403 = vmatmul.mubr.f32.gmra.mxu0 %v683_v24  ;;  %v627_v33 = vpop.f32.mrf.mxu0  ;;  %v1275_v1 = vpop.f32.mrf.mxu1  ;;  %v688_v45 = vmax.f32 %v672_v62, 0.0 }
 0x1c3   :  { %v686_v35 = vmax.f32 %v1849_v32, 0.0  ;;  %v628_v37 = vadd.f32 %v627_v33, %v482_v10  ;;  %1349 = vmatprep.mubr.f32.mxu1 %v684_v30  ;;  %1425 = vmatprep.subr.mxu1 %v1733_v4  ;;  %v673_v42 = vadd.f32 %v1831_v46, %v636_v36 }
 0x1c4   :  { %1405 = vmatprep.mubr.f32.mxu0 %v684_v30  ;;  %1441 = vmatpush3.msra.mxu1 %v1733_v4  ;;  %v1306_v38 = vpop.f32.mrf.mxu0 }
 0x1c5   :  { %v671_v39 = vadd.f32 %v1831_v46, %v628_v37  ;;  %1426 = vmatprep.subr.mxu1 %v1740_v6  ;;  %1350 = vmatmul.mubr.f32.gmra.mxu1 %v685_v34  ;;  %v649_v4 = vadd.f32 %v1306_v38, %v1274_v41  ;;  %v689_v50 = vmax.f32 %v673_v42, 0.0 }
 0x1c6   :  { %1442 = vmatpush3.msra.mxu1 %v1740_v6  ;;  %1406 = vmatmul.mubr.f32.gmra.mxu0 %v685_v34  ;;  %v640_v40 = vpop.f32.mrf.mxu0  ;;  %v498_v6 = vpop.f32.mrf.mxu1 }
 0x1c7   :  { %v687_v43 = vmax.f32 %v671_v39, 0.0  ;;  %v641_v44 = vadd.f32 %v640_v40, %v495_v60  ;;  %1352 = vmatprep.mubr.f32.mxu1 %v686_v35  ;;  %1427 = vmatprep.subr.mxu1 %v1747_v8  ;;  %v676_v54 = vadd.f32 %v1831_v46, %v649_v4 }
 0x1c8   :  { %1443 = vmatpush3.msra.mxu1 %v1747_v8  ;;  %v1307_v47 = vpop.f32.mrf.mxu0 }
 0x1c9   :  { %v674_v48 = vadd.f32 %v1831_v46, %v641_v44  ;;  %1428 = vmatprep.subr.mxu1 %v1754_v11  ;;  %1353 = vmatmul.mubr.f32.gmra.mxu1 %v687_v43  ;;  %v652_v52 = vadd.f32 %v1307_v47, %v1275_v1  ;;  %v692_v56 = vmax.f32 %v676_v54, 0.0 }
 0x1ca   :  { %1444 = vmatpush3.msra.mxu1 %v1754_v11  ;;  %v643_v49 = vpop.f32.mrf.mxu0  ;;  %1355 = vmatprep.mubr.f32.mxu1 %v688_v45 }
 0x1cb   :  { %v690_v51 = vmax.f32 %v674_v48, 0.0  ;;  %v644_v53 = vadd.f32 %v643_v49, %v498_v6  ;;  %1429 = vmatprep.subr.mxu1 %v1761_v14  ;;  %v677_v11 = vadd.f32 %v1831_v46, %v652_v52 }
 0x1cc   :  { %1445 = vmatpush3.msra.mxu1 %v1761_v14 }
 0x1cd   :  { %v675_v8 = vadd.f32 %v1831_v46, %v644_v53  ;;  %1430 = vmatprep.subr.mxu1 %v1773_v21  ;;  %1356 = vmatmul.mubr.f32.gmra.mxu1 %v689_v50  ;;  %v693_v14 = vmax.f32 %v677_v11, 0.0 }
 0x1ce   :  { %1446 = vmatpush3.msra.mxu1 %v1773_v21  ;;  %1358 = vmatprep.mubr.f32.mxu1 %v690_v51  ;;  %v1886_v21 = vstv %s2040_s8 }
 0x1cf   :  { %v691_v55 = vmax.f32 %v675_v8, 0.0  ;;  %1431 = vmatprep.subr.mxu1 %v1783_v23 }
 0x1d0   :  { %1447 = vmatpush3.msra.mxu1 %v1783_v23 }
 0x1d1   :  { %1432 = vmatprep.subr.mxu1 %v1793_v25  ;;  %1359 = vmatmul.mubr.f32.gmra.mxu1 %v691_v55 }
 0x1d2   :  { %1448 = vmatpush3.msra.mxu1 %v1793_v25  ;;  %1361 = vmatprep.mubr.f32.mxu1 %v692_v56 }
 0x1d3   :  { %1433 = vmatprep.subr.mxu1 %v1803_v27 }
 0x1d4   :  { %1449 = vmatpush3.msra.mxu1 %v1803_v27 }
 0x1d5   :  { %1434 = vmatprep.subr.mxu1 %v1813_v29  ;;  %1362 = vmatmul.mubr.f32.gmra.mxu1 %v693_v14 }
 0x1d6   :  { %1450 = vmatpush3.msra.mxu1 %v1813_v29  ;;  %1408 = vmatprep.mubr.f32.mxu1 %v686_v35 }
 0x1d7   :  { %1435 = vmatprep.subr.mxu1 %v1823_v31 }
 0x1d8   :  { %1451 = vmatpush3.msra.mxu1 %v1823_v31 }
 0x1d9   :  { %1409 = vmatmul.mubr.f32.vlgmr.msra.gmra.mxu1 %v687_v43 }
 0x1da   :  { %1411 = vmatprep.mubr.f32.mxu1 %v688_v45 }
 0x1dd   :  { %1412 = vmatmul.mubr.f32.gmra.mxu1 %v689_v50 }
 0x1de   :  { %1414 = vmatprep.mubr.f32.mxu1 %v690_v51 }
 0x1e1   :  { %1415 = vmatmul.mubr.f32.gmra.mxu1 %v691_v55 }
 0x1e2   :  { %1417 = vmatprep.mubr.f32.mxu1 %v692_v56 }
 0x1e5   :  { %1418 = vmatmul.mubr.f32.gmra.mxu1 %v693_v14 }
 0x279   :  { %v1342_v23 = vpop.f32.mrf.mxu1  ;;  %v1398_v25 = vpop.f32.mrf.mxu0 }
 0x27a   :  { %v784_v27 = vadd.f32 %v1342_v23, %v1886_v21  ;;  %1036 = vst.msk [vmem:[%s2041_s10 + $0x8] sm:$0xff] %vm857_vm0, %v1398_v25 }
 0x27b   :  { %v778_v29 = vpop.f32.mrf.mxu1  ;;  %v956_v31 = vpop.f32.mrf.mxu0 }
 0x27c   :  { %859 = vst.msk [vmem:[%s2042_s9 + $0x8] sm:$0xff] %vm857_vm0, %v784_v27  ;;  %v779_v46 = vadd.f32 %v778_v29, %v1886_v21  ;;  %1035 = vst.msk [vmem:[%s2041_s10] sm:$0xff] %vm857_vm0, %v956_v31 }
 0x27d   :  { %v1345_v57 = vpop.f32.mrf.mxu1 }
 0x27e   :  { %858 = vst.msk [vmem:[%s2042_s9] sm:$0xff] %vm857_vm0, %v779_v46  ;;  %v794_v59 = vadd.f32 %v1345_v57, %v1886_v21  ;;  %v1401_v61 = vpop.f32.mrf.mxu0 }
 0x27f   :  { %1038 = vst.msk [vmem:[%s2041_s10 + $0x18] sm:$0xff] %vm857_vm0, %v1401_v61  ;;  %v788_v63 = vpop.f32.mrf.mxu1 }
 0x280   :  { %861 = vst.msk [vmem:[%s2042_s9 + $0x18] sm:$0xff] %vm857_vm0, %v794_v59  ;;  %v789_v0 = vadd.f32 %v788_v63, %v1886_v21  ;;  %v966_v2 = vpop.f32.mrf.mxu0 }
 0x281   :  { %1037 = vst.msk [vmem:[%s2041_s10 + $0x10] sm:$0xff] %vm857_vm0, %v966_v2  ;;  %v1348_v3 = vpop.f32.mrf.mxu1 }
 0x282   :  { %860 = vst.msk [vmem:[%s2042_s9 + $0x10] sm:$0xff] %vm857_vm0, %v789_v0  ;;  %v804_v5 = vadd.f32 %v1348_v3, %v1886_v21  ;;  %v1404_v7 = vpop.f32.mrf.mxu0 }
 0x283   :  { %1040 = vst.msk [vmem:[%s2041_s10 + $0x28] sm:$0xff] %vm857_vm0, %v1404_v7  ;;  %v798_v9 = vpop.f32.mrf.mxu1 }
 0x284   :  { %863 = vst.msk [vmem:[%s2042_s9 + $0x28] sm:$0xff] %vm857_vm0, %v804_v5  ;;  %v799_v10 = vadd.f32 %v798_v9, %v1886_v21  ;;  %v976_v12 = vpop.f32.mrf.mxu0 }
 0x285   :  { %1039 = vst.msk [vmem:[%s2041_s10 + $0x20] sm:$0xff] %vm857_vm0, %v976_v12  ;;  %v1351_v13 = vpop.f32.mrf.mxu1 }
 0x286   :  { %862 = vst.msk [vmem:[%s2042_s9 + $0x20] sm:$0xff] %vm857_vm0, %v799_v10  ;;  %v814_v15 = vadd.f32 %v1351_v13, %v1886_v21  ;;  %v1407_v16 = vpop.f32.mrf.mxu0 }
 0x287   :  { %1042 = vst.msk [vmem:[%s2041_s10 + $0x38] sm:$0xff] %vm857_vm0, %v1407_v16  ;;  %v808_v17 = vpop.f32.mrf.mxu1 }
 0x288   :  { %865 = vst.msk [vmem:[%s2042_s9 + $0x38] sm:$0xff] %vm857_vm0, %v814_v15  ;;  %v809_v18 = vadd.f32 %v808_v17, %v1886_v21  ;;  %v986_v19 = vpop.f32.mrf.mxu0 }
 0x289   :  { %1041 = vst.msk [vmem:[%s2041_s10 + $0x30] sm:$0xff] %vm857_vm0, %v986_v19  ;;  %v1354_v41 = vpop.f32.mrf.mxu1 }
 0x28a   :  { %864 = vst.msk [vmem:[%s2042_s9 + $0x30] sm:$0xff] %vm857_vm0, %v809_v18  ;;  %v824_v20 = vadd.f32 %v1354_v41, %v1886_v21 }
 0x28b   :  { %v818_v22 = vpop.f32.mrf.mxu1 }
 0x28c   :  { %867 = vst.msk [vmem:[%s2042_s9 + $0x48] sm:$0xff] %vm857_vm0, %v824_v20  ;;  %v819_v24 = vadd.f32 %v818_v22, %v1886_v21 }
 0x28d   :  { %v1357_v26 = vpop.f32.mrf.mxu1 }
 0x28e   :  { %866 = vst.msk [vmem:[%s2042_s9 + $0x40] sm:$0xff] %vm857_vm0, %v819_v24  ;;  %v834_v58 = vadd.f32 %v1357_v26, %v1886_v21 }
 0x28f   :  { %v828_v28 = vpop.f32.mrf.mxu1 }
 0x290   :  { %869 = vst.msk [vmem:[%s2042_s9 + $0x58] sm:$0xff] %vm857_vm0, %v834_v58  ;;  %v829_v30 = vadd.f32 %v828_v28, %v1886_v21 }
 0x291   :  { %v1360_v32 = vpop.f32.mrf.mxu1 }
 0x292   :  { %868 = vst.msk [vmem:[%s2042_s9 + $0x50] sm:$0xff] %vm857_vm0, %v829_v30  ;;  %v844_v60 = vadd.f32 %v1360_v32, %v1886_v21 }
 0x293   :  { %v838_v33 = vpop.f32.mrf.mxu1 }
 0x294   :  { %871 = vst.msk [vmem:[%s2042_s9 + $0x68] sm:$0xff] %vm857_vm0, %v844_v60  ;;  %v839_v34 = vadd.f32 %v838_v33, %v1886_v21 }
 0x295   :  { %v1363_v35 = vpop.f32.mrf.mxu1 }
 0x296   :  { %870 = vst.msk [vmem:[%s2042_s9 + $0x60] sm:$0xff] %vm857_vm0, %v839_v34  ;;  %v854_v36 = vadd.f32 %v1363_v35, %v1886_v21 }
 0x297   :  { %v848_v37 = vpop.f32.mrf.mxu1 }
 0x298   :  { %873 = vst.msk [vmem:[%s2042_s9 + $0x78] sm:$0xff] %vm857_vm0, %v854_v36  ;;  %v849_v62 = vadd.f32 %v848_v37, %v1886_v21 }
 0x299   :  { %v1410_v38 = vpop.f32.mrf.mxu1 }
 0x29a   :  { %872 = vst.msk [vmem:[%s2042_s9 + $0x70] sm:$0xff] %vm857_vm0, %v849_v62  ;;  %1044 = vst.msk [vmem:[%s2041_s10 + $0x48] sm:$0xff] %vm857_vm0, %v1410_v38 }
 0x29b   :  { %v996_v39 = vpop.f32.mrf.mxu1 }
 0x29c   :  { %1043 = vst.msk [vmem:[%s2041_s10 + $0x40] sm:$0xff] %vm857_vm0, %v996_v39 }
 0x29d   :  { %v1413_v1 = vpop.f32.mrf.mxu1 }
 0x29e   :  { %1046 = vst.msk [vmem:[%s2041_s10 + $0x58] sm:$0xff] %vm857_vm0, %v1413_v1 }
 0x29f   :  { %v1006_v40 = vpop.f32.mrf.mxu1 }
 0x2a0   :  { %1045 = vst.msk [vmem:[%s2041_s10 + $0x50] sm:$0xff] %vm857_vm0, %v1006_v40 }
 0x2a1   :  { %v1416_v42 = vpop.f32.mrf.mxu1 }
 0x2a2   :  { %1048 = vst.msk [vmem:[%s2041_s10 + $0x68] sm:$0xff] %vm857_vm0, %v1416_v42 }
 0x2a3   :  { %v1016_v43 = vpop.f32.mrf.mxu1 }
 0x2a4   :  { %1047 = vst.msk [vmem:[%s2041_s10 + $0x60] sm:$0xff] %vm857_vm0, %v1016_v43 }
 0x2a5   :  { %v1419_v44 = vpop.f32.mrf.mxu1 }
 0x2a6   :  { %1050 = vst.msk [vmem:[%s2041_s10 + $0x78] sm:$0xff] %vm857_vm0, %v1419_v44 }
 0x2a7   :  { %v1026_v45 = vpop.f32.mrf.mxu1 }
 0x2a8   :  { %1049 = vst.msk [vmem:[%s2041_s10 + $0x70] sm:$0xff] %vm857_vm0, %v1026_v45 }

</bundles_post_ra>
